<compile_context>
chip_gen: v6e
topology: v6e:2x2x1
jax: 0.10.0
libtpu: 0.0.40
codegen_flags: <defaults>
</compile_context>

<pallas_src>
import functools

import jax
import jax.numpy as jnp
from jax.experimental import pallas as pl
from jax.experimental.pallas import tpu as pltpu

_HIGHEST = jax.lax.Precision.HIGHEST


def _round_up(x, m):
    return ((x + m - 1) // m) * m


# ---------------------------------------------------------------------------
# Kernel
# ---------------------------------------------------------------------------
def _centprobe_kernel(e1_ref, e2_ref, wa_ref, wb_ref, b_ref, out_ref):
    # e*_ref: [tm, E*fold] in the caller's native dtype (bf16 or f32);
    # w*_ref: [E*fold, 3*fold] f32 (block-diagonal when folded); b_ref: [1, 3*fold].
    out = (jnp.dot(e1_ref[...], wa_ref[...],
                   preferred_element_type=jnp.float32, precision=_HIGHEST)
           + jnp.dot(e2_ref[...], wb_ref[...],
                     preferred_element_type=jnp.float32, precision=_HIGHEST)
           + b_ref[...])                                  # [tm, 3*fold]
    out_ref[...] = out


# ---------------------------------------------------------------------------
# Parameter collapse (activation-free stack -> single affine map)
# ---------------------------------------------------------------------------
def collapse_params(params):
    """Returns (Wa [E,3], Wb [E,3], b_eff [1,3]) with
    cat([e1, e2]) @ W_eff + b_eff == e1 @ Wa + e2 @ Wb + b_eff.

    Note: this reassociates float ops relative to the layer-by-layer module
    (acceptable; see the loosened test tolerance)."""
    w1a, w1b, b1, wh, bh, wf, bf = params
    E = w1a.shape[0]
    w = jnp.concatenate([w1a, w1b], axis=0)               # [2E, H]
    b = b1                                                # [1, H]
    for l in range(wh.shape[0]):
        w = jnp.dot(w, wh[l], precision=_HIGHEST)
        b = jnp.dot(b, wh[l], precision=_HIGHEST) + bh[l][None, :]
    w = jnp.dot(w, wf, precision=_HIGHEST)                # [2E, 3]
    b = jnp.dot(b, wf, precision=_HIGHEST) + bf           # [1, 3]
    return w[:E], w[E:], b


# ---------------------------------------------------------------------------
# Tiling / lane-folding heuristics
# ---------------------------------------------------------------------------
def _pick_fold(B, E, target_lanes=512):
    """Largest power-of-2 fold f with E*f <= target_lanes and f | B."""
    if E >= 128:
        return 1
    f = 1
    while f * 2 * E <= target_lanes:
        f *= 2
    while f > 1 and B % f != 0:
        f //= 2
    return f


def _pick_tile(Bf, tm_rows_req, fold, lanes, itemsize):
    """Rows-per-grid-step over the folded batch (Bf rows of width `lanes`)."""
    tm_f = max(1, tm_rows_req // fold)
    # Keep each (double-buffered) input block <= ~2 MiB of VMEM.
    lanes_padded = _round_up(lanes, 128)
    tm_f = min(tm_f, max(16, (2 * 1024 * 1024) // (lanes_padded * itemsize)))
    if Bf <= tm_f:
        return Bf                                  # one full-extent block
    # Prefer >= 8 grid steps (pipelining + v7x megacore) without tiny steps.
    tm_f = min(tm_f, max(512, pl.cdiv(Bf, 8)))
    tm_f = max(16, _round_up(tm_f, 16))            # bf16-friendly sublane packing
    return min(tm_f, Bf)


# ---------------------------------------------------------------------------
# Forward
# ---------------------------------------------------------------------------
@functools.partial(jax.jit, static_argnames=("tm",))
def centprobe_forward(emb1, emb2, params, *, tm=8192):
    """emb1, emb2: [B, E] float arrays (any float dtype, streamed as-is).
    Returns [B, 3] float32."""
    B, E = emb1.shape
    wa, wb, b_eff = collapse_params(params)        # [E,3], [E,3], [1,3]  (f32)
    n_out = wa.shape[1]

    # Lane folding: [B, E] -> [B/f, E*f] is a free row-major view; the
    # block-diagonal weights make each folded row produce f independent outputs.
    fold = _pick_fold(B, E)
    Bf, lanes, n_out_f = B // fold, E * fold, n_out * fold
    e1 = emb1.reshape(Bf, lanes)
    e2 = emb2.reshape(Bf, lanes)
    if fold > 1:
        eye = jnp.eye(fold, dtype=wa.dtype)
        wa = jnp.kron(eye, wa)                     # [E*f, 3*f] block-diagonal
        wb = jnp.kron(eye, wb)
        b_eff = jnp.tile(b_eff, (1, fold))         # [1, 3*f]

    tm_f = _pick_tile(Bf, tm, fold, lanes, e1.dtype.itemsize)
    grid = (pl.cdiv(Bf, tm_f),)                    # ragged last block is fine

    out = pl.pallas_call(
        _centprobe_kernel,
        out_shape=jax.ShapeDtypeStruct((Bf, n_out_f), jnp.float32),
        grid=grid,
        in_specs=[
            pl.BlockSpec((tm_f, lanes), lambda i: (i, 0)),     # emb1 (streamed)
            pl.BlockSpec((tm_f, lanes), lambda i: (i, 0)),     # emb2 (streamed)
            pl.BlockSpec((lanes, n_out_f), lambda i: (0, 0)),  # Wa   (VMEM-resident)
            pl.BlockSpec((lanes, n_out_f), lambda i: (0, 0)),  # Wb   (VMEM-resident)
            pl.BlockSpec((1, n_out_f), lambda i: (0, 0)),      # b    (VMEM-resident)
        ],
        out_specs=pl.BlockSpec((tm_f, n_out_f), lambda i: (i, 0)),
        compiler_params=pltpu.CompilerParams(
            dimension_semantics=("parallel",)),
    )(e1, e2, wa, wb, b_eff)

    return out.reshape(B, n_out)


# ---------------------------------------------------------------------------
# Synthetic params + plain-JAX reference (mirrors the PyTorch module)
# ---------------------------------------------------------------------------
def init_params(key, emb_dim, hidden_dim=8, hidden_layers_num=5, n_out=3):
    """Deterministic synthetic parameters (shapes match CentProbe.__init__),
    stored pre-transposed as [in_features, out_features]."""
    ks = jax.random.split(key, 6)
    s_first = 1.0 / float(2 * emb_dim) ** 0.5
    s_hid = 1.0 / float(hidden_dim) ** 0.5
    w_first = jax.random.normal(ks[0], (2 * emb_dim, hidden_dim), jnp.float32) * s_first
    w1a, w1b = w_first[:emb_dim], w_first[emb_dim:]
    b1 = jax.random.normal(ks[1], (1, hidden_dim), jnp.float32) * s_hid
    wh = jax.random.normal(ks[2], (hidden_layers_num, hidden_dim, hidden_dim),
                           jnp.float32) * s_hid
    bh = jax.random.normal(ks[3], (hidden_layers_num, hidden_dim), jnp.float32) * s_hid
    wf = jax.random.normal(ks[4], (hidden_dim, n_out), jnp.float32) * s_hid
    bf = jax.random.normal(ks[5], (1, n_out), jnp.float32) * s_hid
    return (w1a, w1b, b1, wh, bh, wf, bf)


def reference_forward(emb1, emb2, params):
    """Layer-by-layer reference mirroring the PyTorch module (f32, HIGHEST)."""
    w1a, w1b, b1, wh, bh, wf, bf = params
    h = jnp.concatenate([emb1.astype(jnp.float32), emb2.astype(jnp.float32)], axis=-1)
    w_first = jnp.concatenate([w1a, w1b], axis=0)
    h = jnp.dot(h, w_first, precision=_HIGHEST) + b1
    for l in range(wh.shape[0]):
        h = jnp.dot(h, wh[l], precision=_HIGHEST) + bh[l][None, :]
    return jnp.dot(h, wf, precision=_HIGHEST) + bf


if __name__ == "__main__":
    key = jax.random.PRNGKey(0)
    k1, k2, kp = jax.random.split(key, 3)

    E, H, L = 32, 8, 5                     # emb_dim, hidden_dim, hidden_layers_num
    params = init_params(kp, E, hidden_dim=H, hidden_layers_num=L)

    # 1) f32 embeddings streamed natively; tiny batch (fold=16, single block).
    B = 16
    e1 = jax.random.normal(k1, (B, E), jnp.float32)
    e2 = jax.random.normal(k2, (B, E), jnp.float32)
    out = jax.block_until_ready(centprobe_forward(e1, e2, params))
    ref = reference_forward(e1, e2, params)
    assert out.shape == (B, 3)
    # Tolerance loosened vs 1e-5: the affine collapse reassociates float ops
    # relative to the layer-by-layer reference.
    assert jnp.allclose(out, ref, atol=1e-3, rtol=1e-3)

    # 2) bf16 embeddings streamed natively (no wrapper cast), fold=8 path.
    B2 = 200
    e1b = jax.random.normal(jax.random.PRNGKey(1), (B2, E), jnp.float32).astype(jnp.bfloat16)
    e2b = jax.random.normal(jax.random.PRNGKey(2), (B2, E), jnp.float32).astype(jnp.bfloat16)
    out2 = jax.block_until_ready(centprobe_forward(e1b, e2b, params))
    ref2 = reference_forward(e1b, e2b, params)
    assert out2.shape == (B2, 3)
    assert jnp.allclose(out2, ref2, atol=1e-3, rtol=1e-3)

    # 3) Odd batch (fold falls back to 1) with a small tile -> multi-step grid
    #    with a ragged (garbage-in/garbage-out) last block, no padding pass.
    B3 = 37
    e1c = jax.random.normal(jax.random.PRNGKey(3), (B3, E), jnp.float32)
    e2c = jax.random.normal(jax.random.PRNGKey(4), (B3, E), jnp.float32)
    out3 = jax.block_until_ready(centprobe_forward(e1c, e2c, params, tm=16))
    ref3 = reference_forward(e1c, e2c, params)
    assert out3.shape == (B3, 3)
    assert jnp.allclose(out3, ref3, atol=1e-3, rtol=1e-3)

    print("KERNEL_OK")
</pallas_src>

<mosaic_0001>
module attributes {stable_mosaic.version = 11 : i64} {
  func.func @_centprobe_kernel(%arg0: i32, %arg1: memref<1x512xf32, #tpu.memory_space<vmem>>, %arg2: memref<1x512xf32, #tpu.memory_space<vmem>>, %arg3: memref<512x48xf32, #tpu.memory_space<vmem>>, %arg4: memref<512x48xf32, #tpu.memory_space<vmem>>, %arg5: memref<1x48xf32, #tpu.memory_space<vmem>>, %arg6: memref<1x48xf32, #tpu.memory_space<vmem>>) attributes {dimension_semantics = [#tpu.dimension_semantics<parallel>], iteration_bounds = array<i64: 1>, scalar_prefetch = 0 : i64, scratch_operands = 0 : i64, tpu.core_type = #tpu.core_type<tc>, window_params = [{transform_indices = @transform_0, window_bounds = array<i64: 1, 512>}, {transform_indices = @transform_1, window_bounds = array<i64: 1, 512>}, {pipeline_mode = #tpu.pipeline_mode<synchronous>, transform_indices = @transform_2, window_bounds = array<i64: 512, 48>}, {pipeline_mode = #tpu.pipeline_mode<synchronous>, transform_indices = @transform_3, window_bounds = array<i64: 512, 48>}, {pipeline_mode = #tpu.pipeline_mode<synchronous>, transform_indices = @transform_4, window_bounds = array<i64: 1, 48>}, {transform_indices = @transform_5, window_bounds = array<i64: 1, 48>}]} {
    %c0 = arith.constant 0 : index
    %c0_0 = arith.constant 0 : index
    %0 = vector.load %arg1[%c0, %c0_0] : memref<1x512xf32, #tpu.memory_space<vmem>>, vector<1x512xf32>
    %c0_1 = arith.constant 0 : index
    %c0_2 = arith.constant 0 : index
    %1 = vector.load %arg3[%c0_1, %c0_2] : memref<512x48xf32, #tpu.memory_space<vmem>>, vector<512x48xf32>
    %cst = arith.constant dense<0.000000e+00> : vector<1x48xf32>
    %2 = tpu.matmul %0, %1, %cst {dimension_numbers = #tpu.dot_dimension_numbers<[1], [0], [0], [1], [0, 0, 1, 1], [], []>, precision = #tpu.contract_precision<fp32>} : vector<1x512xf32>, vector<512x48xf32>, vector<1x48xf32> -> vector<1x48xf32>
    %c0_3 = arith.constant 0 : index
    %c0_4 = arith.constant 0 : index
    %3 = vector.load %arg2[%c0_3, %c0_4] : memref<1x512xf32, #tpu.memory_space<vmem>>, vector<1x512xf32>
    %c0_5 = arith.constant 0 : index
    %c0_6 = arith.constant 0 : index
    %4 = vector.load %arg4[%c0_5, %c0_6] : memref<512x48xf32, #tpu.memory_space<vmem>>, vector<512x48xf32>
    %cst_7 = arith.constant dense<0.000000e+00> : vector<1x48xf32>
    %5 = tpu.matmul %3, %4, %cst_7 {dimension_numbers = #tpu.dot_dimension_numbers<[1], [0], [0], [1], [0, 0, 1, 1], [], []>, precision = #tpu.contract_precision<fp32>} : vector<1x512xf32>, vector<512x48xf32>, vector<1x48xf32> -> vector<1x48xf32>
    %6 = arith.addf %2, %5 : vector<1x48xf32>
    %c0_8 = arith.constant 0 : index
    %c0_9 = arith.constant 0 : index
    %7 = vector.load %arg5[%c0_8, %c0_9] : memref<1x48xf32, #tpu.memory_space<vmem>>, vector<1x48xf32>
    %8 = arith.addf %6, %7 : vector<1x48xf32>
    %c0_10 = arith.constant 0 : index
    %c0_11 = arith.constant 0 : index
    %9 = vector.load %arg6[%c0_10, %c0_11] : memref<1x48xf32, #tpu.memory_space<vmem>>, vector<1x48xf32>
    tpu.vector_store %arg6[%c0_10, %c0_11], %8 {strides = array<i32>} : memref<1x48xf32, #tpu.memory_space<vmem>>, vector<1x48xf32>,
    return
  }
  func.func @transform_0(%arg0: i32) -> (i32, i32) {
    %c0_i32 = arith.constant 0 : i32
    %c0_i32_0 = arith.constant 0 : i32
    return %arg0, %c0_i32 : i32, i32
  }
  func.func @transform_1(%arg0: i32) -> (i32, i32) {
    %c0_i32 = arith.constant 0 : i32
    %c0_i32_0 = arith.constant 0 : i32
    return %arg0, %c0_i32 : i32, i32
  }
  func.func @transform_2(%arg0: i32) -> (i32, i32) {
    %c0_i32 = arith.constant 0 : i32
    %c0_i32_0 = arith.constant 0 : i32
    %c0_i32_1 = arith.constant 0 : i32
    return %c0_i32, %c0_i32_0 : i32, i32
  }
  func.func @transform_3(%arg0: i32) -> (i32, i32) {
    %c0_i32 = arith.constant 0 : i32
    %c0_i32_0 = arith.constant 0 : i32
    %c0_i32_1 = arith.constant 0 : i32
    return %c0_i32, %c0_i32_0 : i32, i32
  }
  func.func @transform_4(%arg0: i32) -> (i32, i32) {
    %c0_i32 = arith.constant 0 : i32
    %c0_i32_0 = arith.constant 0 : i32
    %c0_i32_1 = arith.constant 0 : i32
    return %c0_i32, %c0_i32_0 : i32, i32
  }
  func.func @transform_5(%arg0: i32) -> (i32, i32) {
    %c0_i32 = arith.constant 0 : i32
    %c0_i32_0 = arith.constant 0 : i32
    return %arg0, %c0_i32 : i32, i32
  }
}

</mosaic_0001>

<bundles_post_ra>
// kernel: centprobe_forward.1
= control target key start
LH: loop header
LB: loop body
LE: loop exit
PB: predicated region body
PF: predicated region fallthrough
CT: control target
= control target key end

     0   :  { %vm3642_vm0 = vcmask 385024   ;;  %s7320_s3 = inlined_call_operand.vmem [shape: f32[512,48], index: 3, kind: input, shape index: {}]   ;;  %s7321_s1 = inlined_call_operand.vmem [shape: f32[1,512], index: 1, kind: input, shape index: {}]   ;;  %s7322_s2 = inlined_call_operand.vmem [shape: f32[512,48], index: 2, kind: input, shape index: {}]   ;;  %s7323_s0 = inlined_call_operand.vmem [shape: f32[1,512], index: 0, kind: input, shape index: {}]   ;;  %s7324_s4 = inlined_call_operand.vmem [shape: f32[1,48], index: 4, kind: input, shape index: {}]   ;;  %s7325_s5 = inlined_call_operand.vmem [shape: f32[1,48], index: 5, kind: output, shape index: {}]  }
   0x1   :  { %v117_v0 = vld [vmem:[%s7320_s3 + $0xf8] sm:$0xff]  ;;  %v116_v2 = vld [vmem:[%s7320_s3 + $0xf0] sm:$0xff]  ;;  %v115_v7 = vld [vmem:[%s7320_s3 + $0xe8] sm:$0xff] }
   0x2   :  { %v101_v1 = vld [vmem:[%s7320_s3 + $0x78] sm:$0xff]  ;;  %v4527_v3 = vand.u32 4294901760, %v117_v0  ;;  %v4531_v5 = vand.u32 4294901760, %v116_v2  ;;  %v100_v6 = vld [vmem:[%s7320_s3 + $0x70] sm:$0xff]  ;;  %v99_v8 = vld [vmem:[%s7320_s3 + $0x68] sm:$0xff]  ;;  %v4544_v10 = vand.u32 4294901760, %v115_v7 }
   0x3   :  { %v4529_v4 = vand.u32 4294901760, %v101_v1  ;;  %v4542_v9 = vand.u32 4294901760, %v100_v6  ;;  %v4546_v11 = vand.u32 4294901760, %v99_v8  ;;  %v114_v12 = vld [vmem:[%s7320_s3 + $0xe0] sm:$0xff]  ;;  %v4557_v14 = vld [vmem:[%s7320_s3 + $0xd8] sm:$0xff]  ;;  %v4578_v21 = vld [vmem:[%s7320_s3 + $0xd0] sm:$0xff] }
   0x4   :  { %v98_v13 = vld [vmem:[%s7320_s3 + $0x60] sm:$0xff]  ;;  %3648 = vmatprep.subr.mxu0 %v4527_v3  ;;  %v4560_v16 = vand.u32 4294901760, %v114_v12  ;;  %v4565_v18 = vand.u32 4294901760, %v4557_v14  ;;  %v4568_v19 = vsub.f32 %v117_v0, %v4527_v3  ;;  %v4573_v20 = vld [vmem:[%s7320_s3 + $0x58] sm:$0xff]  ;;  %v4583_v22 = vld [vmem:[%s7320_s3 + $0x50] sm:$0xff]  ;;  %v4593_v25 = vand.u32 4294901760, %v4578_v21 }
   0x5   :  { %v4562_v17 = vand.u32 4294901760, %v98_v13  ;;  %3649 = vmatpush3.msra.mxu0 %v4529_v4  ;;  %v4587_v23 = vand.u32 4294901760, %v4573_v20  ;;  %v4590_v24 = vsub.f32 %v101_v1, %v4529_v4  ;;  %v4596_v26 = vsub.f32 %v116_v2, %v4531_v5  ;;  %v4601_v27 = vld [vmem:[%s7320_s3 + $0xc8] sm:$0xff]  ;;  %v4611_v29 = vld [vmem:[%s7320_s3 + $0xc0] sm:$0xff]  ;;  %v4663_v47 = vld [vmem:[%s7320_s3 + $0xb8] sm:$0xff] }
   0x6   :  { %7615 = vst [vmem:[#allocation2_spill] sm:$0xff] %v4568_v19  ;;  %v4606_v28 = vld [vmem:[%s7320_s3 + $0x48] sm:$0xff]  ;;  %3650 = vmatprep.subr.mxu0 %v4531_v5  ;;  %v7339_v30 = vand.u32 4294901760, %v4568_v19  ;;  %v4616_v31 = vand.u32 4294901760, %v4583_v22  ;;  %v4619_v32 = vsub.f32 %v100_v6, %v4542_v9  ;;  %v4622_v33 = vand.u32 4294901760, %v4601_v27  ;;  %v4636_v38 = vld [vmem:[%s7320_s3 + $0x40] sm:$0xff] }
   0x7   :  { %3651 = vmatpush3.msra.mxu0 %v4542_v9  ;;  %v7337_v34 = vand.u32 4294901760, %v4590_v24  ;;  %v7336_v35 = vand.u32 4294901760, %v4596_v26  ;;  %v4628_v36 = vsub.f32 %v115_v7, %v4544_v10  ;;  %v4631_v37 = vand.u32 4294901760, %v4606_v28  ;;  %v4676_v52 = vld [vmem:[%s7320_s3 + $0x38] sm:$0xff]  ;;  %v4686_v57 = vld [vmem:[%s7320_s3 + $0xb0] sm:$0xff]  ;;  %v4717_v6 = vld [vmem:[%s7320_s3 + $0xa8] sm:$0xff] }
   0x8   :  { %3652 = vmatprep.subr.mxu0 %v4544_v10  ;;  %v399_v39 = vsub.f32 %v4568_v19, %v7339_v30  ;;  %v7334_v40 = vand.u32 4294901760, %v4619_v32  ;;  %v4644_v41 = vsub.f32 %v99_v8, %v4546_v11  ;;  %v4647_v42 = vand.u32 4294901760, %v4611_v29  ;;  %v4701_v62 = vld [vmem:[%s7320_s3 + $0x30] sm:$0xff]  ;;  %v4853_v30 = vld [vmem:[%s7320_s3 + $0x88] sm:$0xff] }
   0x9   :  { %3653 = vmatpush3.msra.mxu0 %v4546_v11  ;;  %v287_v43 = vsub.f32 %v4590_v24, %v7337_v34  ;;  %v406_v44 = vsub.f32 %v4596_v26, %v7336_v35  ;;  %v7332_v45 = vand.u32 4294901760, %v4628_v36  ;;  %v4658_v46 = vsub.f32 %v114_v12, %v4560_v16 }
   0xa   :  { %7616 = vst [vmem:[#allocation3_spill] sm:$0xff] %v4647_v42  ;;  %3654 = vmatprep.subr.mxu0 %v4560_v16  ;;  %v400_v48 = vand.u32 4294901760, %v399_v39  ;;  %v294_v49 = vsub.f32 %v4619_v32, %v7334_v40  ;;  %v7331_v50 = vand.u32 4294901760, %v4644_v41  ;;  %v4671_v51 = vand.u32 4294901760, %v4636_v38  ;;  %v4826_v40 = vld [vmem:[%s7320_s3 + $0x90] sm:$0xff] }
   0xb   :  { %3655 = vmatpush3.msra.mxu0 %v4562_v17  ;;  %v288_v53 = vand.u32 4294901760, %v287_v43  ;;  %v407_v54 = vand.u32 4294901760, %v406_v44  ;;  %v413_v55 = vsub.f32 %v4628_v36, %v7332_v45  ;;  %v7329_v56 = vand.u32 4294901760, %v4658_v46  ;;  %v4810_v45 = vld [vmem:[%s7320_s3 + $0x18] sm:$0xff] }
   0xc   :  { %7617 = vst [vmem:[#allocation4_spill] sm:$0xff] %v4671_v51  ;;  %3656 = vmatprep.subr.mxu0 %v4565_v18  ;;  %3683 = vmatprep.subr.mxu1 %v400_v48  ;;  %v295_v58 = vand.u32 4294901760, %v294_v49  ;;  %v301_v59 = vsub.f32 %v4644_v41, %v7331_v50  ;;  %v4693_v60 = vsub.f32 %v98_v13, %v4562_v17  ;;  %v4696_v61 = vand.u32 4294901760, %v4663_v47 }
   0xd   :  { %3657 = vmatpush3.msra.mxu0 %v4587_v23  ;;  %3684 = vmatpush3.msra.mxu1 %v288_v53  ;;  %v414_v63 = vand.u32 4294901760, %v413_v55  ;;  %v420_v0 = vsub.f32 %v4658_v46, %v7329_v56  ;;  %v4709_v1 = vsub.f32 %v4557_v14, %v4565_v18  ;;  %v4712_v2 = vand.u32 4294901760, %v4676_v52  ;;  %v4731_v14 = vld [vmem:[%s7320_s3 + $0x28] sm:$0xff] }
   0xe   :  { %7618 = vst [vmem:[#allocation5_spill] sm:$0xff] %v4696_v61  ;;  %3658 = vmatprep.subr.mxu0 %v4593_v25  ;;  %3685 = vmatprep.subr.mxu1 %v407_v54  ;;  %v302_v7 = vand.u32 4294901760, %v301_v59  ;;  %v7327_v8 = vand.u32 4294901760, %v4693_v60  ;;  %v4723_v12 = vsub.f32 %v4573_v20, %v4587_v23  ;;  %v4726_v13 = vand.u32 4294901760, %v4686_v57 }
   0xf   :  { %7619 = vst [vmem:[#allocation6_spill] sm:$0xff] %v4712_v2  ;;  %3659 = vmatpush3.msra.mxu0 %v4616_v31  ;;  %3686 = vmatpush3.msra.mxu1 %v295_v58  ;;  %v421_v39 = vand.u32 4294901760, %v420_v0  ;;  %v7326_v43 = vand.u32 4294901760, %v4709_v1  ;;  %v4737_v44 = vsub.f32 %v4578_v21, %v4593_v25  ;;  %v4740_v20 = vand.u32 4294901760, %v4701_v62  ;;  %v4757_v21 = vld [vmem:[%s7320_s3 + $0xa0] sm:$0xff] }
  0x10   :  { %7620 = vst [vmem:[#allocation7_spill] sm:$0xff] %v4726_v13  ;;  %3660 = vmatprep.subr.mxu0 %v4622_v33  ;;  %3687 = vmatprep.subr.mxu1 %v414_v63  ;;  %v308_v48 = vsub.f32 %v4693_v60, %v7327_v8  ;;  %v7328_v49 = vand.u32 4294901760, %v4723_v12  ;;  %v4749_v53 = vsub.f32 %v4583_v22, %v4616_v31  ;;  %v4752_v54 = vand.u32 4294901760, %v4717_v6 }
  0x11   :  { %7621 = vst [vmem:[#allocation8_spill] sm:$0xff] %v4740_v20  ;;  %3661 = vmatpush3.msra.mxu0 %v4631_v37  ;;  %3688 = vmatpush3.msra.mxu1 %v302_v7  ;;  %v427_v55 = vsub.f32 %v4709_v1, %v7326_v43  ;;  %v7330_v58 = vand.u32 4294901760, %v4737_v44  ;;  %v4766_v22 = vsub.f32 %v4601_v27, %v4622_v33  ;;  %v4769_v59 = vand.u32 4294901760, %v4731_v14  ;;  %v4783_v27 = vld [vmem:[%s7320_s3 + $0x20] sm:$0xff] }
  0x12   :  { %7622 = vst [vmem:[#allocation9_spill] sm:$0xff] %v4752_v54  ;;  %3662 = vmatprep.subr.mxu0 %v4647_v42  ;;  %3689 = vmatprep.subr.mxu1 %v421_v39  ;;  %v309_v63 = vand.u32 4294901760, %v308_v48  ;;  %v315_v0 = vsub.f32 %v4723_v12, %v7328_v49  ;;  %v7333_v7 = vand.u32 4294901760, %v4749_v53  ;;  %v4778_v43 = vsub.f32 %v4606_v28, %v4631_v37  ;;  %v4796_v28 = vld [vmem:[%s7320_s3 + $0x98] sm:$0xff] }
  0x13   :  { %7623 = vst [vmem:[#allocation10_spill] sm:$0xff] %v4769_v59  ;;  %3663 = vmatpush3.msra.mxu0 %v4671_v51  ;;  %v428_v8 = vand.u32 4294901760, %v427_v55  ;;  %v434_v39 = vsub.f32 %v4737_v44, %v7330_v58  ;;  %v7335_v48 = vand.u32 4294901760, %v4766_v22  ;;  %v4791_v49 = vand.u32 4294901760, %v4757_v21 }
  0x14   :  { %3690 = vmatpush3.msra.mxu1 %v309_v63  ;;  %3664 = vmatprep.subr.mxu0 %v4696_v61  ;;  %v316_v56 = vand.u32 4294901760, %v315_v0  ;;  %v322_v55 = vsub.f32 %v4749_v53, %v7333_v7  ;;  %v7338_v58 = vand.u32 4294901760, %v4778_v43  ;;  %v4805_v50 = vsub.f32 %v4611_v29, %v4647_v42 }
  0x15   :  { %7624 = vst [vmem:[#allocation11_spill] sm:$0xff] %v4791_v49  ;;  %3691 = vmatprep.subr.mxu1 %v428_v8  ;;  %3665 = vmatpush3.msra.mxu0 %v4712_v2  ;;  %v435_v63 = vand.u32 4294901760, %v434_v39  ;;  %v441_v0 = vsub.f32 %v4766_v22, %v7335_v48  ;;  %v4817_v7 = vand.u32 4294901760, %v4783_v27  ;;  %v4821_v29 = vsub.f32 %v4636_v38, %v4671_v51  ;;  %v4839_v38 = vld [vmem:[%s7320_s3 + $0x10] sm:$0xff] }
  0x16   :  { %3692 = vmatpush3.msra.mxu1 %v316_v56  ;;  %3666 = vmatprep.subr.mxu0 %v4726_v13  ;;  %v323_v8 = vand.u32 4294901760, %v322_v55  ;;  %v329_v39 = vsub.f32 %v4778_v43, %v7338_v58  ;;  %v7342_v48 = vand.u32 4294901760, %v4805_v50  ;;  %v4834_v35 = vand.u32 4294901760, %v4796_v28 }
  0x17   :  { %7625 = vst [vmem:[#allocation12_spill] sm:$0xff] %v4817_v7  ;;  %3693 = vmatprep.subr.mxu1 %v435_v63  ;;  %3667 = vmatpush3.msra.mxu0 %v4740_v20  ;;  %v442_v56 = vand.u32 4294901760, %v441_v0  ;;  %v7343_v55 = vand.u32 4294901760, %v4821_v29  ;;  %v4845_v34 = vsub.f32 %v4663_v47, %v4696_v61  ;;  %v4848_v58 = vand.u32 4294901760, %v4810_v45 }
  0x18   :  { %7626 = vst [vmem:[#allocation13_spill] sm:$0xff] %v4834_v35  ;;  %3694 = vmatpush3.msra.mxu1 %v323_v8  ;;  %3668 = vmatprep.subr.mxu0 %v4752_v54  ;;  %v330_v63 = vand.u32 4294901760, %v329_v39  ;;  %v448_v0 = vsub.f32 %v4805_v50, %v7342_v48  ;;  %v4861_v47 = vsub.f32 %v4676_v52, %v4712_v2  ;;  %v4864_v15 = vand.u32 4294901760, %v4826_v40  ;;  %v4881_v52 = vld [vmem:[%s7320_s3 + $0x8] sm:$0xff] }
  0x19   :  { %7627 = vst [vmem:[#allocation14_spill] sm:$0xff] %v4848_v58  ;;  %3695 = vmatprep.subr.mxu1 %v442_v56  ;;  %3669 = vmatpush3.msra.mxu0 %v4769_v59  ;;  %v336_v8 = vsub.f32 %v4821_v29, %v7343_v55  ;;  %v4873_v61 = vsub.f32 %v4686_v57, %v4726_v13  ;;  %v4876_v48 = vand.u32 4294901760, %v4839_v38  ;;  %v4890_v57 = vand.u32 4294901760, %v4853_v30  ;;  %v4895_v13 = vld [vmem:[%s7320_s3 + $0x80] sm:$0xff] }
  0x1a   :  { %7628 = vst [vmem:[#allocation15_spill] sm:$0xff] %v4861_v47  ;;  %7629 = vst [vmem:[#allocation16_spill] sm:$0xff] %v4864_v15  ;;  %3696 = vmatpush3.msra.mxu1 %v330_v63  ;;  %3670 = vmatprep.subr.mxu0 %v4791_v49  ;;  %v449_v56 = vand.u32 4294901760, %v448_v0  ;;  %v4887_v39 = vsub.f32 %v4701_v62, %v4740_v20  ;;  %v7634_v2 = vand.u32 4294901760, %v4845_v34  ;;  %v7635_v20 = vand.u32 4294901760, %v4861_v47 }
  0x1b   :  { %7630 = vst [vmem:[#allocation17_spill] sm:$0xff] %v4873_v61  ;;  %7631 = vst [vmem:[#allocation18_spill] sm:$0xff] %v4876_v48  ;;  %3671 = vmatpush3.msra.mxu0 %v4817_v7  ;;  %v337_v63 = vand.u32 4294901760, %v336_v8  ;;  %v7360_v55 = vand.u32 4294901760, %v4873_v61  ;;  %v4904_v62 = vsub.f32 %v4717_v6, %v4752_v54  ;;  %v4912_v8 = vand.u32 4294901760, %v4881_v52  ;;  %v4921_v6 = vld [vmem:[%s7320_s3] sm:$0xff] }
  0x1c   :  { %7632 = vst [vmem:[#allocation19_spill] sm:$0xff] %v4887_v39  ;;  %7633 = vst [vmem:[#allocation20_spill] sm:$0xff] %v4890_v57  ;;  %v455_v0 = vsub.f32 %v4845_v34, %v7634_v2  ;;  %3697 = vmatprep.subr.mxu1 %v449_v56  ;;  %3672 = vmatprep.subr.mxu0 %v4834_v35  ;;  %v343_v51 = vsub.f32 %v4861_v47, %v7635_v20  ;;  %v4929_v54 = vand.u32 4294901760, %v4895_v13 }
  0x1d   :  { %7636 = vst [vmem:[#allocation21_spill] sm:$0xff] %v4912_v8  ;;  %v4916_v2 = vsub.f32 %v4731_v14, %v4769_v59  ;;  %3698 = vmatpush3.msra.mxu1 %v337_v63  ;;  %3673 = vmatpush3.msra.mxu0 %v4848_v58  ;;  %v462_v20 = vsub.f32 %v4873_v61, %v7360_v55  ;;  %v7367_v42 = vand.u32 4294901760, %v4904_v62  ;;  %v7638_v59 = vand.u32 4294901760, %v4887_v39 }
  0x1e   :  { %v456_v56 = vand.u32 4294901760, %v455_v0  ;;  %7637 = vst [vmem:[#allocation22_spill] sm:$0xff] %v4929_v54  ;;  %v344_v14 = vand.u32 4294901760, %v343_v51  ;;  %3674 = vmatprep.subr.mxu0 %v4864_v15  ;;  %v4938_v0 = vsub.f32 %v4757_v21, %v4791_v49  ;;  %v4945_v61 = vand.u32 4294901760, %v4921_v6 }
  0x1f   :  { %v350_v47 = vsub.f32 %v4887_v39, %v7638_v59  ;;  %v463_v55 = vand.u32 4294901760, %v462_v20  ;;  %3675 = vmatpush3.msra.mxu0 %v4876_v48  ;;  %v469_v51 = vsub.f32 %v4904_v62, %v7367_v42  ;;  %v4949_v59 = vsub.f32 %v4783_v27, %v4817_v7 }
  0x20   :  { %3699 = vmatprep.subr.mxu1 %v456_v56  ;;  %7639 = vst [vmem:[#allocation23_spill] sm:$0xff] %v4945_v61  ;;  %3676 = vmatprep.subr.mxu0 %v4890_v57  ;;  %v7640_v21 = vand.u32 4294901760, %v4916_v2  ;;  %v7370_v20 = vand.u32 4294901760, %v4938_v0  ;;  %v7641_v49 = vlaneseq }
  0x21   :  { %3700 = vmatpush3.msra.mxu1 %v344_v14  ;;  %v351_v63 = vand.u32 4294901760, %v350_v47  ;;  %v470_v42 = vand.u32 4294901760, %v469_v51  ;;  %3677 = vmatpush3.msra.mxu0 %v4912_v8  ;;  %v4964_v47 = vld [vmem:[%s7321_s1] sm:$0xf]  ;;  %v4968_v14 = vsub.f32 %v4796_v28, %v4834_v35  ;;  %v7644_v28 = vand.u32 4294901760, %v4949_v59 }
  0x22   :  { %v357_v56 = vsub.f32 %v4916_v2, %v7640_v21  ;;  %v4957_v39 = vshrl.u32 %v7641_v49, 7  ;;  %3701 = vmatprep.subr.mxu1 %v463_v55  ;;  %7643 = vst [vmem:[#allocation25_spill] sm:$0xff] %v4964_v47  ;;  %v4972_v21 = vsub.f32 %v4810_v45, %v4848_v58  ;;  %3678 = vmatprep.subr.mxu0 %v4929_v54 }
  0x23   :  { %3702 = vmatpush3.msra.mxu1 %v351_v63  ;;  %v476_v55 = vsub.f32 %v4938_v0, %v7370_v20  ;;  %3679 = vmatpush3.msra.mxu0 %v4945_v61  ;;  %v364_v45 = vsub.f32 %v4949_v59, %v7644_v28  ;;  %v4988_v58 = vsub.f32 %v4826_v40, %v4864_v15  ;;  %v7645_v40 = vand.u32 4294901760, %v4968_v14 }
  0x24   :  { %7642 = vst [vmem:[#allocation24_spill] sm:$0xff] %v4957_v39  ;;  %v358_v49 = vand.u32 4294901760, %v357_v56  ;;  %v7373_v51 = vsub.s32 1, %v4957_v39  ;;  %v7377_v27 = vsub.s32 0, %v4957_v39  ;;  %3703 = vmatprep.subr.mxu1 %v470_v42  ;;  %3718 = vmatprep.subr.mxu0 %v4568_v19  ;;  %v4999_v63 = vsub.f32 %v4839_v38, %v4876_v48 }
  0x25   :  { %v477_v20 = vand.u32 4294901760, %v476_v55  ;;  %v365_v56 = vand.u32 4294901760, %v364_v45  ;;  %v7646_v55 = vand.u32 4294901760, %v4972_v21  ;;  %v5015_v38 = vsub.f32 %v4853_v30, %v4890_v57 }
  0x26   :  { %3704 = vmatpush3.msra.mxu1 %v358_v49  ;;  %v158_v42 = vrot.slane %v4964_v47, %v7373_v51  ;;  %v154_v28 = vrot.slane %v4964_v47, %v7377_v27  ;;  %v483_v49 = vsub.f32 %v4968_v14, %v7645_v40  ;;  %v7380_v51 = vand.u32 4294901760, %v4988_v58 }
  0x27   :  { %v371_v15 = vsub.f32 %v4972_v21, %v7646_v55  ;;  %3705 = vmatprep.subr.mxu1 %v477_v20  ;;  %v5022_v20 = vsub.f32 %v4881_v52, %v4912_v8  ;;  %v7649_v30 = vand.u32 4294901760, %v4999_v63  ;;  %v5038_v52 = vsub.f32 %v4895_v13, %v4929_v54 }
  0x28   :  { %v5008_v19 = vand.u32 4294901760, %v158_v42  ;;  %v5010_v39 = vand.u32 4294901760, %v154_v28  ;;  %3706 = vmatpush3.msra.mxu1 %v365_v56  ;;  %v484_v45 = vand.u32 4294901760, %v483_v49  ;;  %v490_v55 = vsub.f32 %v4988_v58, %v7380_v51 }
  0x29   :  { %v372_v40 = vand.u32 4294901760, %v371_v15  ;;  %v378_v56 = vsub.f32 %v4999_v63, %v7649_v30  ;;  %v7385_v51 = vand.u32 4294901760, %v5022_v20 }
  0x2a   :  { %7647 = vst [vmem:[#allocation26_spill] sm:$0xff] %v5008_v19  ;;  %7648 = vst [vmem:[#allocation27_spill] sm:$0xff] %v5010_v39  ;;  %v5025_v47 = vsub.f32 %v158_v42, %v5008_v19  ;;  %v5028_v27 = vsub.f32 %v154_v28, %v5010_v39  ;;  %508 = vmatprep.mubr.f32.mxu1 %v5008_v19  ;;  %3707 = vmatprep.subr.mxu1 %v484_v45  ;;  %v491_v49 = vand.u32 4294901760, %v490_v55 }
  0x2b   :  { %v5042_v42 = vsub.f32 %v4921_v6, %v4945_v61  ;;  %3708 = vmatpush3.msra.mxu1 %v372_v40  ;;  %v379_v15 = vand.u32 4294901760, %v378_v56  ;;  %v7651_v19 = vand.u32 4294901760, %v5015_v38  ;;  %v385_v13 = vsub.f32 %v5022_v20, %v7385_v51 }
  0x2c   :  { %v7390_v28 = vand.u32 4294901760, %v5025_v47  ;;  %v7395_v30 = vand.u32 4294901760, %v5028_v27  ;;  %3709 = vmatprep.subr.mxu1 %v491_v49  ;;  %v7394_v55 = vand.u32 4294901760, %v5038_v52 }
  0x2d   :  { %7650 = vst [vmem:[#allocation28_spill] sm:$0xff] %v5042_v42  ;;  %v497_v45 = vsub.f32 %v5015_v38, %v7651_v19  ;;  %v7393_v6 = vand.u32 4294901760, %v5042_v42  ;;  %3710 = vmatpush3.msra.mxu1 %v379_v15  ;;  %v386_v19 = vand.u32 4294901760, %v385_v13  ;;  %v7657_v15 = vld [vmem:[#allocation5_spill] sm:$0xff]  ;;  %v7660_v13 = vld [vmem:[#allocation8_spill] sm:$0xff] }
  0x2e   :  { %v270_v61 = vsub.f32 %v5025_v47, %v7390_v28  ;;  %v276_v40 = vsub.f32 %v5028_v27, %v7395_v30  ;;  %v504_v49 = vsub.f32 %v5038_v52, %v7394_v55  ;;  %v7666_v55 = vld [vmem:[#allocation2_spill] sm:$0xff] }
  0x2f   :  { %v498_v56 = vand.u32 4294901760, %v497_v45  ;;  %v392_v51 = vsub.f32 %v5042_v42, %v7393_v6  ;;  %v7659_v45 = vld [vmem:[#allocation7_spill] sm:$0xff]  ;;  %v7665_v6 = vld [vmem:[#allocation16_spill] sm:$0xff]  ;;  %v7667_v30 = vand.u32 4294901760, %v7666_v55 }
  0x30   :  { %v271_v54 = vand.u32 4294901760, %v270_v61  ;;  %v277_v8 = vand.u32 4294901760, %v276_v40  ;;  %v505_v28 = vand.u32 4294901760, %v504_v49  ;;  %v7652_v61 = vld [vmem:[#allocation15_spill] sm:$0xff]  ;;  %v7661_v40 = vld [vmem:[#allocation9_spill] sm:$0xff]  ;;  %v7664_v49 = vld [vmem:[#allocation14_spill] sm:$0xff] }
  0x31   :  { %3711 = vmatprep.subr.mxu1 %v498_v56  ;;  %v393_v57 = vand.u32 4294901760, %v392_v51  ;;  %v7656_v51 = vld [vmem:[#allocation19_spill] sm:$0xff]  ;;  %v7662_v56 = vld [vmem:[#allocation10_spill] sm:$0xff] }
  0x32   :  { %3712 = vmatpush3.msra.mxu1 %v386_v19  ;;  %272 = vmatprep.mubr.f32.mxu0 %v271_v54  ;;  %v7653_v54 = vld [vmem:[#allocation3_spill] sm:$0xff] }
  0x33   :  { %278 = vmatmul.mubr.f32.vlgmr.msra.gmra.mxu0 %v277_v8  ;;  %3713 = vmatprep.subr.mxu1 %v505_v28  ;;  %v7655_v8 = vld [vmem:[#allocation4_spill] sm:$0xff]  ;;  %v7658_v28 = vld [vmem:[#allocation6_spill] sm:$0xff]  ;;  %v7663_v19 = vld [vmem:[#allocation11_spill] sm:$0xff] }
  0x34   :  { %3719 = vmatpush3.msra.mxu0 %v4590_v24  ;;  %3714 = vmatpush3.msra.mxu1 %v393_v57  ;;  %v7654_v57 = vld [vmem:[#allocation17_spill] sm:$0xff]  ;;  %v7675_v55 = vld [vmem:[#allocation23_spill] sm:$0xff] }
  0x35   :  { %3720 = vmatprep.subr.mxu0 %v4596_v26  ;;  %510 = vmatmul.mubr.f32.vlgmr.msra.gmra.mxu1 %v5010_v39  ;;  %v7668_v39 = vand.u32 4294901760, %v4590_v24  ;;  %v7676_v24 = vand.u32 4294901760, %v4644_v41 }
  0x36   :  { %3721 = vmatpush3.msra.mxu0 %v4619_v32  ;;  %3753 = vmatprep.subr.mxu1 %v4527_v3 }
  0x37   :  { %3722 = vmatprep.subr.mxu0 %v4628_v36  ;;  %3754 = vmatpush3.msra.mxu1 %v4529_v4 }
  0x38   :  { %3723 = vmatpush3.msra.mxu0 %v4644_v41  ;;  %3755 = vmatprep.subr.mxu1 %v4531_v5  ;;  %v7682_v41 = vand.u32 4294901760, %v4723_v12 }
  0x39   :  { %3724 = vmatprep.subr.mxu0 %v4658_v46  ;;  %3756 = vmatpush3.msra.mxu1 %v4542_v9 }
  0x3a   :  { %3725 = vmatpush3.msra.mxu0 %v4693_v60  ;;  %3757 = vmatprep.subr.mxu1 %v4544_v10 }
  0x3b   :  { %3726 = vmatprep.subr.mxu0 %v4709_v1  ;;  %3758 = vmatpush3.msra.mxu1 %v4546_v11 }
  0x3c   :  { %3727 = vmatpush3.msra.mxu0 %v4723_v12  ;;  %3759 = vmatprep.subr.mxu1 %v4560_v16 }
  0x3d   :  { %3728 = vmatprep.subr.mxu0 %v4737_v44  ;;  %3760 = vmatpush3.msra.mxu1 %v4562_v17 }
  0x3e   :  { %3729 = vmatpush3.msra.mxu0 %v4749_v53  ;;  %3761 = vmatprep.subr.mxu1 %v4565_v18 }
  0x3f   :  { %3730 = vmatprep.subr.mxu0 %v4766_v22  ;;  %3762 = vmatpush3.msra.mxu1 %v4587_v23 }
  0x40   :  { %3731 = vmatpush3.msra.mxu0 %v4778_v43  ;;  %3763 = vmatprep.subr.mxu1 %v4593_v25 }
  0x41   :  { %3732 = vmatprep.subr.mxu0 %v4805_v50  ;;  %3764 = vmatpush3.msra.mxu1 %v4616_v31 }
  0x42   :  { %3733 = vmatpush3.msra.mxu0 %v4821_v29  ;;  %3765 = vmatprep.subr.mxu1 %v4622_v33 }
  0x43   :  { %3734 = vmatprep.subr.mxu0 %v4845_v34  ;;  %3766 = vmatpush3.msra.mxu1 %v4631_v37 }
  0x44   :  { %3735 = vmatpush3.msra.mxu0 %v7652_v61  ;;  %3767 = vmatprep.subr.mxu1 %v7653_v54 }
  0x45   :  { %3736 = vmatprep.subr.mxu0 %v7654_v57  ;;  %3768 = vmatpush3.msra.mxu1 %v7655_v8 }
  0x46   :  { %3737 = vmatpush3.msra.mxu0 %v7656_v51  ;;  %3769 = vmatprep.subr.mxu1 %v7657_v15 }
  0x47   :  { %3738 = vmatprep.subr.mxu0 %v4904_v62  ;;  %3770 = vmatpush3.msra.mxu1 %v7658_v28 }
  0x48   :  { %3739 = vmatpush3.msra.mxu0 %v4916_v2  ;;  %3771 = vmatprep.subr.mxu1 %v7659_v45 }
  0x49   :  { %3740 = vmatprep.subr.mxu0 %v4938_v0  ;;  %3772 = vmatpush3.msra.mxu1 %v7660_v13 }
  0x4a   :  { %3741 = vmatpush3.msra.mxu0 %v4949_v59  ;;  %3773 = vmatprep.subr.mxu1 %v7661_v40 }
  0x4b   :  { %3742 = vmatprep.subr.mxu0 %v4968_v14  ;;  %3774 = vmatpush3.msra.mxu1 %v7662_v56 }
  0x4c   :  { %3743 = vmatpush3.msra.mxu0 %v4972_v21  ;;  %3775 = vmatprep.subr.mxu1 %v7663_v19 }
  0x4d   :  { %3744 = vmatprep.subr.mxu0 %v4988_v58  ;;  %645 = vmatprep.mubr.f32.mxu0 %v5025_v47 }
  0x4e   :  { %3745 = vmatpush3.msra.mxu0 %v4999_v63  ;;  %3776 = vmatpush3.msra.mxu1 %v4817_v7  ;;  %v7671_v7 = vld [vmem:[#allocation21_spill] sm:$0xff] }
  0x4f   :  { %3746 = vmatprep.subr.mxu0 %v5015_v38  ;;  %3777 = vmatprep.subr.mxu1 %v4834_v35  ;;  %v7669_v35 = vld [vmem:[#allocation20_spill] sm:$0xff] }
  0x50   :  { %3747 = vmatpush3.msra.mxu0 %v5022_v20  ;;  %3778 = vmatpush3.msra.mxu1 %v7664_v49  ;;  %v7670_v49 = vand.u32 4294901760, %v4596_v26  ;;  %v7678_v26 = vand.u32 4294901760, %v4658_v46  ;;  %v7683_v46 = vand.u32 4294901760, %v4737_v44  ;;  %v7689_v44 = vand.u32 4294901760, %v4845_v34 }
  0x51   :  { %3748 = vmatprep.subr.mxu0 %v5038_v52  ;;  %3779 = vmatprep.subr.mxu1 %v7665_v6  ;;  %v7672_v6 = vand.u32 4294901760, %v4619_v32  ;;  %v7680_v32 = vand.u32 4294901760, %v4693_v60  ;;  %v7684_v60 = vand.u32 4294901760, %v4749_v53  ;;  %v131_v53 = vld [vmem:[%s7320_s3 + $0x168] sm:$0xff] }
  0x52   :  { %3749 = vmatpush3.msra.mxu0 %v5042_v42  ;;  %3780 = vmatpush3.msra.mxu1 %v4876_v48  ;;  %v7673_v42 = vld [vmem:[#allocation22_spill] sm:$0xff]  ;;  %v7674_v48 = vand.u32 4294901760, %v4628_v36  ;;  %v7681_v36 = vand.u32 4294901760, %v4709_v1  ;;  %v7687_v1 = vand.u32 4294901760, %v4805_v50  ;;  %v147_v50 = vld [vmem:[%s7320_s3 + $0x1e8] sm:$0xff] }
  0x53   :  { %648 = vmatmul.mubr.f32.vlgmr.msra.gmra.mxu0 %v5028_v27  ;;  %3788 = vmatprep.subr.mxu0 %v7667_v30  ;;  %v7679_v30 = vand.u32 4294901760, %v5028_v27  ;;  %v5215_v34 = vand.u32 4294901760, %v147_v50  ;;  %v7694_v27 = vand.u32 4294901760, %v7656_v51  ;;  %v145_v51 = vld [vmem:[%s7320_s3 + $0x1d8] sm:$0xff] }
  0x54   :  { %3789 = vmatpush3.msra.mxu0 %v7668_v39  ;;  %3781 = vmatprep.subr.mxu1 %v7669_v35  ;;  %v7677_v39 = vand.u32 4294901760, %v5025_v47 }
  0x55   :  { %3790 = vmatprep.subr.mxu0 %v7670_v49  ;;  %3782 = vmatpush3.msra.mxu1 %v7671_v7  ;;  %7693 = vst [vmem:[#allocation3_spill] sm:$0xff] %v5215_v34  ;;  %v7699_v49 = vand.u32 4294901760, %v4938_v0 }
  0x56   :  { %3791 = vmatpush3.msra.mxu0 %v7672_v6  ;;  %3783 = vmatprep.subr.mxu1 %v7673_v42  ;;  %v7696_v6 = vand.u32 4294901760, %v4904_v62  ;;  %v129_v62 = vld [vmem:[%s7320_s3 + $0x158] sm:$0xff] }
  0x57   :  { %3792 = vmatprep.subr.mxu0 %v7674_v48  ;;  %3784 = vmatpush3.msra.mxu1 %v7675_v55  ;;  %v7692_v48 = vand.u32 4294901760, %v7654_v57  ;;  %v7697_v57 = vand.u32 4294901760, %v4916_v2 }
  0x58   :  { %3793 = vmatpush3.msra.mxu0 %v7676_v24  ;;  %752 = vmatprep.mubr.f32.mxu1 %v7677_v39  ;;  %v128_v24 = vld [vmem:[%s7320_s3 + $0x150] sm:$0xff]  ;;  %v5261_v39 = vsub.f32 %v147_v50, %v5215_v34 }
  0x59   :  { %3794 = vmatprep.subr.mxu0 %v7678_v26  ;;  %756 = vmatmul.mubr.f32.vlgmr.msra.gmra.mxu1 %v7679_v30  ;;  %v7701_v26 = vand.u32 4294901760, %v4949_v59  ;;  %v7702_v30 = vand.u32 4294901760, %v4968_v14  ;;  %v144_v59 = vld [vmem:[%s7320_s3 + $0x1d0] sm:$0xff] }
  0x5a   :  { %3795 = vmatpush3.msra.mxu0 %v7680_v32  ;;  %3823 = vmatprep.subr.mxu1 %v4527_v3  ;;  %v133_v3 = vld [vmem:[%s7320_s3 + $0x178] sm:$0xff]  ;;  %v5273_v32 = vand.u32 4294901760, %v145_v51 }
  0x5b   :  { %3796 = vmatprep.subr.mxu0 %v7681_v36  ;;  %3824 = vmatpush3.msra.mxu1 %v4529_v4  ;;  %v7685_v4 = vand.u32 4294901760, %v4766_v22  ;;  %v5183_v12 = vand.u32 4294901760, %v133_v3  ;;  %v7691_v22 = vand.u32 4294901760, %v7652_v61  ;;  %v5275_v36 = vand.u32 4294901760, %v129_v62 }
  0x5c   :  { %3797 = vmatpush3.msra.mxu0 %v7682_v41  ;;  %3825 = vmatprep.subr.mxu1 %v4531_v5  ;;  %v149_v5 = vld [vmem:[%s7320_s3 + $0x1f8] sm:$0xff]  ;;  %7703 = vst [vmem:[#allocation5_spill] sm:$0xff] %v5273_v32  ;;  %v7705_v41 = vand.u32 4294901760, %v4972_v21 }
  0x5d   :  { %3798 = vmatprep.subr.mxu0 %v7683_v46  ;;  %3826 = vmatpush3.msra.mxu1 %v4542_v9  ;;  %v7686_v9 = vand.u32 4294901760, %v4778_v43  ;;  %v7688_v43 = vand.u32 4294901760, %v4821_v29  ;;  %v146_v29 = vld [vmem:[%s7320_s3 + $0x1e0] sm:$0xff]  ;;  %7704 = vst [vmem:[#allocation6_spill] sm:$0xff] %v5275_v36  ;;  %v5285_v46 = vand.u32 4294901760, %v128_v24 }
  0x5e   :  { %3799 = vmatpush3.msra.mxu0 %v7684_v60  ;;  %3827 = vmatprep.subr.mxu1 %v4544_v10  ;;  %v132_v10 = vld [vmem:[%s7320_s3 + $0x170] sm:$0xff]  ;;  %v7707_v60 = vand.u32 4294901760, %v4988_v58 }
  0x5f   :  { %3800 = vmatprep.subr.mxu0 %v7685_v4  ;;  %3828 = vmatpush3.msra.mxu1 %v4546_v11  ;;  %v148_v11 = vld [vmem:[%s7320_s3 + $0x1f0] sm:$0xff]  ;;  %7706 = vst [vmem:[#allocation7_spill] sm:$0xff] %v5285_v46  ;;  %v127_v4 = vld [vmem:[%s7320_s3 + $0x148] sm:$0xff]  ;;  %v5345_v50 = vsub.f32 %v128_v24, %v5285_v46 }
  0x60   :  { %3801 = vmatpush3.msra.mxu0 %v7686_v9  ;;  %3829 = vmatprep.subr.mxu1 %v4560_v16  ;;  %v5191_v16 = vand.u32 4294901760, %v149_v5  ;;  %v143_v9 = vld [vmem:[%s7320_s3 + $0x1c8] sm:$0xff] }
  0x61   :  { %3802 = vmatprep.subr.mxu0 %v7687_v1  ;;  %3830 = vmatpush3.msra.mxu1 %v4562_v17  ;;  %v5199_v17 = vand.u32 4294901760, %v132_v10  ;;  %v7710_v1 = vand.u32 4294901760, %v5015_v38  ;;  %v7711_v38 = vand.u32 4294901760, %v5022_v20  ;;  %7712 = vst [vmem:[#allocation9_spill] sm:$0xff] %v5345_v50  ;;  %v125_v20 = vld [vmem:[%s7320_s3 + $0x138] sm:$0xff] }
  0x62   :  { %3803 = vmatpush3.msra.mxu0 %v7688_v43  ;;  %3831 = vmatprep.subr.mxu1 %v4565_v18  ;;  %v5207_v18 = vand.u32 4294901760, %v148_v11  ;;  %v5229_v47 = vsub.f32 %v149_v5, %v5191_v16  ;;  %v7708_v5 = vand.u32 4294901760, %v4999_v63  ;;  %v5323_v63 = vsub.f32 %v129_v62, %v5275_v36  ;;  %v7719_v62 = vld [vmem:[#allocation12_spill] sm:$0xff] }
  0x63   :  { %3804 = vmatprep.subr.mxu0 %v7689_v44  ;;  %3832 = vmatpush3.msra.mxu1 %v4587_v23  ;;  %7690 = vst [vmem:[#allocation15_spill] sm:$0xff] %v5199_v17  ;;  %v5213_v23 = vsub.f32 %v133_v3, %v5183_v12  ;;  %v5235_v61 = vsub.f32 %v132_v10, %v5199_v17  ;;  %v5347_v44 = vand.u32 4294901760, %v127_v4 }
  0x64   :  { %3805 = vmatpush3.msra.mxu0 %v7691_v22  ;;  %3833 = vmatprep.subr.mxu1 %v4593_v25  ;;  %v5223_v25 = vand.u32 4294901760, %v131_v53  ;;  %v5334_v43 = vsub.f32 %v145_v51, %v5273_v32  ;;  %v126_v22 = vld [vmem:[%s7320_s3 + $0x140] sm:$0xff] }
  0x65   :  { %3806 = vmatprep.subr.mxu0 %v7692_v48  ;;  %3834 = vmatpush3.msra.mxu1 %v4616_v31  ;;  %v130_v31 = vld [vmem:[%s7320_s3 + $0x160] sm:$0xff]  ;;  %7713 = vst [vmem:[#allocation10_spill] sm:$0xff] %v5347_v44 }
  0x66   :  { %3807 = vmatpush3.msra.mxu0 %v7694_v27  ;;  %3835 = vmatprep.subr.mxu1 %v4622_v33  ;;  %7695 = vst [vmem:[#allocation17_spill] sm:$0xff] %v5223_v25  ;;  %v5240_v33 = vand.u32 4294901760, %v146_v29  ;;  %v5254_v2 = vand.u32 4294901760, %v130_v31  ;;  %v5267_v0 = vsub.f32 %v131_v53, %v5223_v25  ;;  %v7715_v48 = vld [vmem:[#allocation26_spill] sm:$0xff]  ;;  %v5360_v27 = vand.u32 4294901760, %v143_v9 }
  0x67   :  { %3808 = vmatprep.subr.mxu0 %v7696_v6  ;;  %3836 = vmatpush3.msra.mxu1 %v4631_v37  ;;  %v5249_v37 = vsub.f32 %v148_v11, %v5207_v18  ;;  %v142_v11 = vld [vmem:[%s7320_s3 + $0x1c0] sm:$0xff] }
  0x68   :  { %3809 = vmatpush3.msra.mxu0 %v7697_v57  ;;  %3837 = vmatprep.subr.mxu1 %v7653_v54  ;;  %7698 = vst [vmem:[#allocation4_spill] sm:$0xff] %v5240_v33  ;;  %7700 = vst [vmem:[#allocation19_spill] sm:$0xff] %v5254_v2  ;;  %v7407_v54 = vand.u32 4294901760, %v5213_v23  ;;  %v5294_v3 = vsub.f32 %v130_v31, %v5254_v2  ;;  %v7402_v10 = vand.u32 4294901760, %v5267_v0  ;;  %v7717_v57 = vld [vmem:[#allocation28_spill] sm:$0xff]  ;;  %v5377_v24 = vand.u32 4294901760, %v142_v11 }
  0x69   :  { %3810 = vmatprep.subr.mxu0 %v7699_v49  ;;  %3838 = vmatpush3.msra.mxu1 %v7655_v8  ;;  %v7408_v8 = vand.u32 4294901760, %v5229_v47  ;;  %v7406_v14 = vand.u32 4294901760, %v5249_v37  ;;  %7716 = vst [vmem:[#allocation11_spill] sm:$0xff] %v5360_v27  ;;  %v7718_v51 = vand.u32 4294901760, %v7717_v57  ;;  %v5396_v57 = vand.u32 4294901760, %v125_v20 }
  0x6a   :  { %3811 = vmatpush3.msra.mxu0 %v7701_v26  ;;  %3839 = vmatprep.subr.mxu1 %v7657_v15  ;;  %v7404_v15 = vand.u32 4294901760, %v5235_v61  ;;  %v5299_v21 = vsub.f32 %v5213_v23, %v7407_v54  ;;  %v7409_v6 = vand.u32 4294901760, %v5294_v3  ;;  %v5375_v49 = vsub.f32 %v5267_v0, %v7402_v10  ;;  %7720 = vst [vmem:[#allocation2_spill] sm:$0xff] %v5377_v24  ;;  %v5382_v26 = vld [vmem:[%s7320_s3 + $0x1b8] sm:$0xff]  ;;  %v7730_v54 = vld [vmem:[#allocation18_spill] sm:$0xff] }
  0x6b   :  { %3812 = vmatprep.subr.mxu0 %v7702_v30  ;;  %3840 = vmatpush3.msra.mxu1 %v7658_v28  ;;  %v5288_v28 = vsub.f32 %v146_v29, %v5240_v33  ;;  %v5311_v58 = vsub.f32 %v5229_v47, %v7408_v8  ;;  %7724 = vst [vmem:[#allocation21_spill] sm:$0xff] %v5396_v57  ;;  %v7411_v10 = vand.u32 4294901760, %v5323_v63  ;;  %v122_v29 = vld [vmem:[%s7320_s3 + $0x120] sm:$0xff] }
  0x6c   :  { %3813 = vmatpush3.msra.mxu0 %v7705_v41  ;;  %3841 = vmatprep.subr.mxu1 %v7659_v45  ;;  %v7403_v45 = vand.u32 4294901760, %v5261_v39  ;;  %v124_v41 = vld [vmem:[%s7320_s3 + $0x130] sm:$0xff]  ;;  %v5447_v8 = vsub.f32 %v125_v20, %v5396_v57  ;;  %v139_v20 = vld [vmem:[%s7320_s3 + $0x1a8] sm:$0xff] }
  0x6d   :  { %3814 = vmatprep.subr.mxu0 %v7707_v60  ;;  %3842 = vmatpush3.msra.mxu1 %v7660_v13  ;;  %v5313_v13 = vand.u32 4294901760, %v144_v59  ;;  %v7405_v53 = vand.u32 4294901760, %v5288_v28  ;;  %v7721_v60 = vld [vmem:[#allocation27_spill] sm:$0xff] }
  0x6e   :  { %3815 = vmatpush3.msra.mxu0 %v7708_v5  ;;  %3843 = vmatprep.subr.mxu1 %v7661_v40  ;;  %v5328_v40 = vsub.f32 %v5235_v61, %v7404_v15  ;;  %v5365_v31 = vsub.f32 %v5261_v39, %v7403_v45  ;;  %v7722_v5 = vld [vmem:[#allocation13_spill] sm:$0xff]  ;;  %v5413_v45 = vld [vmem:[%s7320_s3 + $0x1b0] sm:$0xff]  ;;  %7731 = vst [vmem:[#allocation28_spill] sm:$0xff] %v5447_v8  ;;  %v5504_v15 = vand.u32 4294901760, %v122_v29 }
  0x6f   :  { %7709 = vst [vmem:[#allocation8_spill] sm:$0xff] %v5313_v13  ;;  %3816 = vmatprep.subr.mxu0 %v7710_v1  ;;  %3844 = vmatpush3.msra.mxu1 %v7662_v56  ;;  %v5342_v56 = vsub.f32 %v5249_v37, %v7406_v14  ;;  %v5385_v30 = vsub.f32 %v144_v59, %v5313_v13  ;;  %v7725_v59 = vld [vmem:[#allocation14_spill] sm:$0xff]  ;;  %v5426_v14 = vand.u32 4294901760, %v124_v41 }
  0x70   :  { %3817 = vmatpush3.msra.mxu0 %v7711_v38  ;;  %3845 = vmatprep.subr.mxu1 %v7663_v19  ;;  %v7714_v19 = vand.u32 4294901760, %v5038_v52  ;;  %v5393_v38 = vand.u32 4294901760, %v126_v22  ;;  %v5434_v1 = vsub.f32 %v143_v9, %v5360_v27  ;;  %v123_v9 = vld [vmem:[%s7320_s3 + $0x128] sm:$0xff]  ;;  %v7733_v52 = vld [vmem:[#allocation24_spill] sm:$0xff]  ;;  %7737 = vst [vmem:[#allocation14_spill] sm:$0xff] %v5504_v15 }
  0x71   :  { %922 = vmatprep.mubr.f32.mxu0 %v7715_v48  ;;  %3846 = vmatpush3.msra.mxu1 %v7719_v62  ;;  %v5402_v62 = vsub.f32 %v127_v4, %v5347_v44  ;;  %v5421_v4 = vsub.f32 %v5294_v3, %v7409_v6  ;;  %7729 = vst [vmem:[#allocation26_spill] sm:$0xff] %v5426_v14 }
  0x72   :  { %3818 = vmatprep.subr.mxu0 %v7714_v19  ;;  %3847 = vmatprep.subr.mxu1 %v7722_v5  ;;  %7723 = vst [vmem:[#allocation20_spill] sm:$0xff] %v5393_v38  ;;  %v7410_v19 = vand.u32 4294901760, %v5334_v43  ;;  %v5407_v5 = vsub.f32 %v5288_v28, %v7405_v53  ;;  %v5424_v53 = vand.u32 4294901760, %v5382_v26  ;;  %v5439_v6 = vsub.f32 %v126_v22, %v5393_v38 }
  0x73   :  { %3819 = vmatpush3.msra.mxu0 %v7718_v51  ;;  %3848 = vmatpush3.msra.mxu1 %v7725_v59  ;;  %7726 = vst [vmem:[#allocation22_spill] sm:$0xff] %v5402_v62  ;;  %v7727_v59 = vld [vmem:[#allocation16_spill] sm:$0xff]  ;;  %v5450_v51 = vand.u32 4294901760, %v5413_v45  ;;  %v5461_v22 = vsub.f32 %v5323_v63, %v7411_v10 }
  0x74   :  { %924 = vmatmul.mubr.f32.vlgmr.msra.gmra.mxu0 %v7721_v60  ;;  %3858 = vmatprep.subr.mxu0 %v5191_v16  ;;  %7728 = vst [vmem:[#allocation23_spill] sm:$0xff] %v5424_v53 }
  0x75   :  { %3859 = vmatpush3.msra.mxu0 %v5183_v12  ;;  %3849 = vmatprep.subr.mxu1 %v7727_v59  ;;  %v7414_v59 = vand.u32 4294901760, %v5385_v30  ;;  %7732 = vst [vmem:[#allocation12_spill] sm:$0xff] %v5450_v51 }
  0x76   :  { %3860 = vmatprep.subr.mxu0 %v5207_v18  ;;  %3850 = vmatpush3.msra.mxu1 %v7730_v54  ;;  %v5444_v54 = vsub.f32 %v5334_v43, %v7410_v19  ;;  %v5467_v19 = vsub.f32 %v142_v11, %v5377_v24  ;;  %v138_v11 = vld [vmem:[%s7320_s3 + $0x1a0] sm:$0xff] }
  0x77   :  { %3861 = vmatpush3.msra.mxu0 %v5199_v17  ;;  %3851 = vmatprep.subr.mxu1 %v7669_v35  ;;  %v5477_v35 = vsub.f32 %v124_v41, %v5426_v14  ;;  %v7741_v41 = vand.u32 4294901760, %v5402_v62 }
  0x78   :  { %3862 = vmatprep.subr.mxu0 %v5215_v34  ;;  %3852 = vmatpush3.msra.mxu1 %v7671_v7  ;;  %v5486_v7 = vsub.f32 %v5385_v30, %v7414_v59  ;;  %v5502_v59 = vand.u32 4294901760, %v139_v20  ;;  %v7739_v34 = vld [vmem:[#allocation25_spill] sm:$0xff] }
  0x79   :  { %3863 = vmatpush3.msra.mxu0 %v5223_v25  ;;  %3853 = vmatprep.subr.mxu1 %v7673_v42  ;;  %v7734_v42 = vand.u32 4294901760, %v5345_v50  ;;  %v5494_v25 = vand.u32 4294901760, %v123_v9 }
  0x7a   :  { %3864 = vmatprep.subr.mxu0 %v5240_v33  ;;  %3854 = vmatpush3.msra.mxu1 %v7675_v55  ;;  %7736 = vst [vmem:[#allocation13_spill] sm:$0xff] %v5502_v59  ;;  %v121_v55 = vld [vmem:[%s7320_s3 + $0x118] sm:$0xff]  ;;  %v5527_v33 = vsub.f32 %v5402_v62, %v7741_v41  ;;  %v1297_v41 = vand.u32 4294901760, %v5486_v7  ;;  %v7744_v62 = vand.u32 4294901760, %v5434_v1 }
  0x7b   :  { %v5491_v10 = vsub.f32 %v5345_v50, %v7734_v42  ;;  %7735 = vst [vmem:[#allocation27_spill] sm:$0xff] %v5494_v25  ;;  %1026 = vmatprep.mubr.f32.mxu1 %v7715_v48  ;;  %3865 = vmatpush3.msra.mxu0 %v5254_v2  ;;  %v5513_v48 = vsub.f32 %v5382_v26, %v5424_v53  ;;  %v7738_v2 = vsub.s32 3, %v7733_v52  ;;  %v5529_v26 = vand.u32 4294901760, %v138_v11 }
  0x7c   :  { %1028 = vmatmul.mubr.f32.vlgmr.msra.gmra.mxu1 %v7721_v60  ;;  %3866 = vmatprep.subr.mxu0 %v5273_v32  ;;  %v7740_v60 = vand.u32 4294901760, %v5311_v58  ;;  %v137_v32 = vld [vmem:[%s7320_s3 + $0x198] sm:$0xff]  ;;  %v5546_v50 = vsub.f32 %v5434_v1, %v7744_v62  ;;  %v5549_v17 = vsub.f32 %v123_v9, %v5494_v25  ;;  %v136_v62 = vld [vmem:[%s7320_s3 + $0x190] sm:$0xff]  ;;  %v7749_v9 = vand.u32 4294901760, %v5467_v19 }
  0x7d   :  { %v166_v42 = vrot.slane %v7739_v34, %v7738_v2  ;;  %3867 = vmatpush3.msra.mxu0 %v5275_v36  ;;  %v7742_v2 = vsub.s32 2, %v7733_v52  ;;  %v7745_v52 = vand.u32 4294901760, %v5342_v56  ;;  %v5569_v56 = vsub.f32 %v5413_v45, %v5450_v51 }
  0x7e   :  { %3893 = vmatprep.subr.mxu1 %v7740_v60  ;;  %v7743_v60 = vand.u32 4294901760, %v5299_v21  ;;  %3868 = vmatprep.subr.mxu0 %v5313_v13  ;;  %v7746_v21 = vand.u32 4294901760, %v5439_v6  ;;  %v5600_v36 = vsub.f32 %v139_v20, %v5502_v59 }
  0x7f   :  { %v162_v58 = vrot.slane %v7739_v34, %v7742_v2  ;;  %3869 = vmatpush3.msra.mxu0 %v5285_v46  ;;  %v5555_v34 = vsub.f32 %v122_v29, %v5504_v15  ;;  %v5562_v2 = vand.u32 4294901760, %v121_v55  ;;  %v120_v29 = vld [vmem:[%s7320_s3 + $0x110] sm:$0xff]  ;;  %v5585_v45 = vand.u32 4294901760, %v166_v42 }
  0x80   :  { %3894 = vmatpush3.msra.mxu1 %v7743_v60  ;;  %v5560_v7 = vsub.f32 %v5439_v6, %v7746_v21  ;;  %3870 = vmatprep.subr.mxu0 %v5360_v27  ;;  %v5580_v60 = vsub.f32 %v5467_v19, %v7749_v9  ;;  %v5582_v21 = vand.u32 4294901760, %v137_v32  ;;  %v7752_v46 = vand.u32 4294901760, %v5365_v31  ;;  %v135_v9 = vld [vmem:[%s7320_s3 + $0x188] sm:$0xff] }
  0x81   :  { %3895 = vmatprep.subr.mxu1 %v7745_v52  ;;  %7747 = vst [vmem:[#allocation16_spill] sm:$0xff] %v5562_v2  ;;  %v7748_v52 = vand.u32 4294901760, %v5328_v40  ;;  %7751 = vst [vmem:[#allocation25_spill] sm:$0xff] %v5585_v45  ;;  %3871 = vmatpush3.msra.mxu0 %v5347_v44  ;;  %v1192_v40 = vand.u32 4294901760, %v5527_v33  ;;  %v5602_v13 = vand.u32 4294901760, %v162_v58  ;;  %v1304_v33 = vand.u32 4294901760, %v5546_v50 }
  0x82   :  { %7750 = vst [vmem:[#allocation18_spill] sm:$0xff] %v5582_v21  ;;  %3872 = vmatprep.subr.mxu0 %v5377_v24  ;;  %v5608_v31 = vand.u32 4294901760, %v136_v62  ;;  %v1199_v20 = vand.u32 4294901760, %v5560_v7  ;;  %v119_v50 = vld [vmem:[%s7320_s3 + $0x108] sm:$0xff]  ;;  %v5625_v24 = vsub.f32 %v138_v11, %v5529_v26  ;;  %v7758_v44 = vand.u32 4294901760, %v5421_v4  ;;  %1370 = vmatprep.mubr.f32.mxu1 %v5585_v45 }
  0x83   :  { %3896 = vmatpush3.msra.mxu1 %v7748_v52  ;;  %v7753_v52 = vand.u32 4294901760, %v5447_v8  ;;  %7754 = vst [vmem:[#allocation29_spill] sm:$0xff] %v5602_v13  ;;  %3873 = vmatpush3.msra.mxu0 %v5393_v38  ;;  %v5634_v7 = vand.u32 4294901760, %v135_v9  ;;  %v5640_v11 = vsub.f32 %v166_v42, %v5585_v45  ;;  %v7760_v4 = vand.u32 4294901760, %v5444_v54 }
  0x84   :  { %3897 = vmatprep.subr.mxu1 %v7752_v46  ;;  %v7755_v46 = vand.u32 4294901760, %v5375_v49  ;;  %7756 = vst [vmem:[#allocation30_spill] sm:$0xff] %v5608_v31  ;;  %v5618_v49 = vsub.f32 %v121_v55, %v5562_v2  ;;  %3874 = vmatprep.subr.mxu0 %v5424_v53  ;;  %v5651_v53 = vsub.f32 %v162_v58, %v5602_v13  ;;  %v7761_v42 = vand.u32 4294901760, %v5461_v22 }
  0x85   :  { %v5594_v27 = vsub.f32 %v5447_v8, %v7753_v52  ;;  %v5610_v52 = vand.u32 4294901760, %v120_v29  ;;  %v7757_v8 = vand.u32 4294901760, %v5407_v5  ;;  %v7759_v5 = vand.u32 4294901760, %v5513_v48  ;;  %3875 = vmatpush3.msra.mxu0 %v5396_v57 }
  0x86   :  { %3898 = vmatpush3.msra.mxu1 %v7755_v46  ;;  %v134_v46 = vld [vmem:[%s7320_s3 + $0x180] sm:$0xff]  ;;  %v5654_v38 = vsub.f32 %v137_v32, %v5582_v21  ;;  %3876 = vmatprep.subr.mxu0 %v5450_v51  ;;  %v7763_v32 = vand.u32 4294901760, %v5569_v56  ;;  %v5676_v51 = vsub.f32 %v136_v62, %v5608_v31 }
  0x87   :  { %3899 = vmatprep.subr.mxu1 %v7757_v8  ;;  %v1311_v8 = vand.u32 4294901760, %v5580_v60  ;;  %v1317_v55 = vsub.f32 %v5513_v48, %v7759_v5  ;;  %v118_v5 = vld [vmem:[%s7320_s3 + $0x100] sm:$0xff]  ;;  %v5660_v54 = vsub.f32 %v120_v29, %v5610_v52  ;;  %v5665_v60 = vand.u32 4294901760, %v119_v50  ;;  %3877 = vmatpush3.msra.mxu0 %v5426_v14 }
  0x88   :  { %3900 = vmatpush3.msra.mxu1 %v7758_v44  ;;  %v1206_v44 = vand.u32 4294901760, %v5594_v27  ;;  %v7762_v27 = vand.u32 4294901760, %v5477_v35  ;;  %v1324_v22 = vsub.f32 %v5569_v56, %v7763_v32  ;;  %3878 = vmatprep.subr.mxu0 %v5502_v59  ;;  %v7765_v32 = vand.u32 4294901760, %v5600_v36 }
  0x89   :  { %3901 = vmatprep.subr.mxu1 %v7760_v4  ;;  %v1318_v58 = vand.u32 4294901760, %v1317_v55  ;;  %3879 = vmatpush3.msra.mxu0 %v5494_v25  ;;  %v5696_v57 = vsub.f32 %v119_v50, %v5665_v60  ;;  %v7801_v45 = vld [vmem:[#allocation18_spill] sm:$0xff] }
  0x8a   :  { %3902 = vmatpush3.msra.mxu1 %v7761_v42  ;;  %v1212_v4 = vsub.f32 %v5477_v35, %v7762_v27  ;;  %v5672_v42 = vand.u32 4294901760, %v134_v46  ;;  %v7764_v27 = vand.u32 4294901760, %v5491_v10  ;;  %v1331_v62 = vsub.f32 %v5600_v36, %v7765_v32  ;;  %3880 = vmatprep.subr.mxu0 %v5529_v26 }
  0x8b   :  { %3903 = vmatprep.subr.mxu1 %v1297_v41  ;;  %v5681_v41 = vand.u32 4294901760, %v118_v5  ;;  %7766 = vst [vmem:[#allocation31_spill] sm:$0xff] %v5696_v57  ;;  %3881 = vmatpush3.msra.mxu0 %v5504_v15  ;;  %v1325_v10 = vand.u32 4294901760, %v1324_v22  ;;  %v7772_v22 = vand.u32 4294901760, %v5555_v34 }
  0x8c   :  { %3904 = vmatpush3.msra.mxu1 %v7764_v27  ;;  %v5692_v27 = vsub.f32 %v135_v9, %v5634_v7  ;;  %v1213_v55 = vand.u32 4294901760, %v1212_v4  ;;  %v7768_v9 = vand.u32 4294901760, %v5625_v24  ;;  %v5708_v4 = vsub.f32 %v134_v46, %v5672_v42  ;;  %3882 = vmatprep.subr.mxu0 %v5582_v21 }
  0x8d   :  { %3905 = vmatprep.subr.mxu1 %v1304_v33  ;;  %v7767_v33 = vand.u32 4294901760, %v5549_v17  ;;  %v5712_v50 = vsub.f32 %v118_v5, %v5681_v41  ;;  %v1226_v32 = vsub.f32 %v5555_v34, %v7772_v22  ;;  %3883 = vmatpush3.msra.mxu0 %v5562_v2  ;;  %v1332_v46 = vand.u32 4294901760, %v1331_v62 }
  0x8e   :  { %3906 = vmatpush3.msra.mxu1 %v1192_v40  ;;  %v1338_v40 = vsub.f32 %v5625_v24, %v7768_v9  ;;  %7769 = vst [vmem:[#allocation32_spill] sm:$0xff] %v5708_v4  ;;  %v7774_v5 = vand.u32 4294901760, %v5654_v38  ;;  %3884 = vmatprep.subr.mxu0 %v5608_v31  ;;  %v7775_v9 = vand.u32 4294901760, %v5618_v49  ;;  %v7776_v2 = vand.u32 4294901760, %v5676_v51 }
  0x8f   :  { %v1219_v14 = vsub.f32 %v5549_v17, %v7767_v33  ;;  %3907 = vmatprep.subr.mxu1 %v1311_v8  ;;  %7770 = vst [vmem:[#allocation33_spill] sm:$0xff] %v5712_v50  ;;  %v7771_v8 = vand.u32 4294901760, %v5640_v11  ;;  %3885 = vmatpush3.msra.mxu0 %v5610_v52  ;;  %v7777_v31 = vand.u32 4294901760, %v5660_v54 }
  0x90   :  { %3908 = vmatpush3.msra.mxu1 %v1199_v20  ;;  %v7773_v20 = vand.u32 4294901760, %v5651_v53  ;;  %v1345_v21 = vsub.f32 %v5654_v38, %v7774_v5  ;;  %v1352_v5 = vsub.f32 %v5676_v51, %v7776_v2  ;;  %3886 = vmatprep.subr.mxu0 %v5634_v7  ;;  %v7778_v2 = vand.u32 4294901760, %v5692_v27 }
  0x91   :  { %v1132_v33 = vsub.f32 %v5640_v11, %v7771_v8  ;;  %3909 = vmatprep.subr.mxu1 %v1318_v58  ;;  %v1220_v22 = vand.u32 4294901760, %v1219_v14  ;;  %v1233_v58 = vsub.f32 %v5618_v49, %v7775_v9  ;;  %v1240_v9 = vsub.f32 %v5660_v54, %v7777_v31  ;;  %3887 = vmatpush3.msra.mxu0 %v5665_v60 }
  0x92   :  { %v1138_v29 = vsub.f32 %v5651_v53, %v7773_v20  ;;  %3910 = vmatpush3.msra.mxu1 %v1206_v44  ;;  %v1339_v20 = vand.u32 4294901760, %v1338_v40  ;;  %v1227_v44 = vand.u32 4294901760, %v1226_v32  ;;  %v1346_v62 = vand.u32 4294901760, %v1345_v21  ;;  %3888 = vmatprep.subr.mxu0 %v5672_v42 }
  0x93   :  { %3911 = vmatprep.subr.mxu1 %v1325_v10  ;;  %v1133_v14 = vand.u32 4294901760, %v1132_v33  ;;  %v7460_v10 = vand.u32 4294901760, %v5712_v50  ;;  %v1359_v8 = vsub.f32 %v5692_v27, %v7778_v2  ;;  %v7779_v32 = vand.u32 4294901760, %v5696_v57  ;;  %3889 = vmatpush3.msra.mxu0 %v5681_v41  ;;  %v7786_v2 = vld [vmem:[#allocation4_spill] sm:$0xff] }
  0x94   :  { %3912 = vmatpush3.msra.mxu1 %v1213_v55  ;;  %v1139_v40 = vand.u32 4294901760, %v1138_v29  ;;  %v1234_v55 = vand.u32 4294901760, %v1233_v58  ;;  %v1353_v31 = vand.u32 4294901760, %v1352_v5  ;;  %v1241_v29 = vand.u32 4294901760, %v1240_v9  ;;  %3928 = vmatprep.subr.mxu0 %v5229_v47  ;;  %v7784_v9 = vld [vmem:[#allocation22_spill] sm:$0xff] }
  0x95   :  { %3913 = vmatprep.subr.mxu1 %v1332_v46  ;;  %v1247_v33 = vsub.f32 %v5696_v57, %v7779_v32  ;;  %v7780_v46 = vand.u32 4294901760, %v5708_v4  ;;  %1134 = vmatprep.mubr.f32.mxu0 %v1133_v14  ;;  %v1360_v58 = vand.u32 4294901760, %v1359_v8  ;;  %v7781_v8 = vld [vmem:[#allocation9_spill] sm:$0xff] }
  0x96   :  { %3914 = vmatpush3.msra.mxu1 %v1220_v22  ;;  %v1254_v22 = vsub.f32 %v5712_v50, %v7460_v10  ;;  %1140 = vmatmul.mubr.f32.vlgmr.msra.gmra.mxu0 %v1139_v40  ;;  %v7785_v40 = vld [vmem:[#allocation17_spill] sm:$0xff]  ;;  %v7799_v10 = vld [vmem:[#allocation12_spill] sm:$0xff] }
  0x97   :  { %3915 = vmatprep.subr.mxu1 %v1339_v20  ;;  %v1366_v21 = vsub.f32 %v5708_v4, %v7780_v46  ;;  %v1248_v20 = vand.u32 4294901760, %v1247_v33  ;;  %3929 = vmatpush3.msra.mxu0 %v5213_v23  ;;  %v7788_v32 = vld [vmem:[#allocation5_spill] sm:$0xff]  ;;  %v7789_v33 = vld [vmem:[#allocation28_spill] sm:$0xff] }
  0x98   :  { %3916 = vmatpush3.msra.mxu1 %v1227_v44  ;;  %3930 = vmatprep.subr.mxu0 %v5249_v37  ;;  %v1255_v14 = vand.u32 4294901760, %v1254_v22  ;;  %v7783_v44 = vld [vmem:[#allocation3_spill] sm:$0xff]  ;;  %v7791_v46 = vld [vmem:[#allocation8_spill] sm:$0xff]  ;;  %v7794_v22 = vld [vmem:[#allocation10_spill] sm:$0xff] }
  0x99   :  { %3917 = vmatprep.subr.mxu1 %v1346_v62  ;;  %v1367_v5 = vand.u32 4294901760, %v1366_v21  ;;  %3931 = vmatpush3.msra.mxu0 %v5235_v61  ;;  %v7782_v62 = vld [vmem:[#allocation15_spill] sm:$0xff] }
  0x9a   :  { %3918 = vmatpush3.msra.mxu1 %v1234_v55  ;;  %3932 = vmatprep.subr.mxu0 %v5261_v39  ;;  %v7787_v55 = vld [vmem:[#allocation19_spill] sm:$0xff] }
  0x9b   :  { %3919 = vmatprep.subr.mxu1 %v1353_v31  ;;  %3933 = vmatpush3.msra.mxu0 %v5267_v0  ;;  %v7790_v31 = vld [vmem:[#allocation6_spill] sm:$0xff]  ;;  %v7792_v21 = vld [vmem:[#allocation7_spill] sm:$0xff] }
  0x9c   :  { %3920 = vmatpush3.msra.mxu1 %v1241_v29  ;;  %3934 = vmatprep.subr.mxu0 %v5288_v28  ;;  %v7793_v29 = vld [vmem:[#allocation11_spill] sm:$0xff] }
  0x9d   :  { %3921 = vmatprep.subr.mxu1 %v1360_v58  ;;  %3935 = vmatpush3.msra.mxu0 %v5294_v3  ;;  %v7795_v58 = vld [vmem:[#allocation2_spill] sm:$0xff] }
  0x9e   :  { %3922 = vmatpush3.msra.mxu1 %v1248_v20  ;;  %3936 = vmatprep.subr.mxu0 %v5334_v43  ;;  %v7796_v20 = vld [vmem:[#allocation20_spill] sm:$0xff] }
  0x9f   :  { %3923 = vmatprep.subr.mxu1 %v1367_v5  ;;  %3937 = vmatpush3.msra.mxu0 %v5323_v63  ;;  %v7797_v5 = vld [vmem:[#allocation23_spill] sm:$0xff] }
  0xa0   :  { %3924 = vmatpush3.msra.mxu1 %v1255_v14  ;;  %3938 = vmatprep.subr.mxu0 %v5385_v30  ;;  %v7798_v14 = vld [vmem:[#allocation21_spill] sm:$0xff] }
  0xa1   :  { %1372 = vmatmul.mubr.f32.vlgmr.msra.gmra.mxu1 %v5602_v13  ;;  %3963 = vmatprep.subr.mxu1 %v5191_v16  ;;  %v7800_v13 = vld [vmem:[#allocation26_spill] sm:$0xff] }
  0xa2   :  { %3964 = vmatpush3.msra.mxu1 %v5183_v12  ;;  %3939 = vmatpush3.msra.mxu0 %v7781_v8 }
  0xa3   :  { %3965 = vmatprep.subr.mxu1 %v5207_v18  ;;  %3940 = vmatprep.subr.mxu0 %v5434_v1 }
  0xa4   :  { %3966 = vmatpush3.msra.mxu1 %v7782_v62  ;;  %3941 = vmatpush3.msra.mxu0 %v7784_v9 }
  0xa5   :  { %3967 = vmatprep.subr.mxu1 %v7783_v44  ;;  %3942 = vmatprep.subr.mxu0 %v5467_v19 }
  0xa6   :  { %3968 = vmatpush3.msra.mxu1 %v7785_v40  ;;  %3943 = vmatpush3.msra.mxu0 %v5439_v6 }
  0xa7   :  { %3969 = vmatprep.subr.mxu1 %v7786_v2  ;;  %3944 = vmatprep.subr.mxu0 %v5513_v48 }
  0xa8   :  { %3970 = vmatpush3.msra.mxu1 %v7787_v55  ;;  %3945 = vmatpush3.msra.mxu0 %v7789_v33 }
  0xa9   :  { %3971 = vmatprep.subr.mxu1 %v7788_v32  ;;  %3946 = vmatprep.subr.mxu0 %v5569_v56 }
  0xaa   :  { %3972 = vmatpush3.msra.mxu1 %v7790_v31  ;;  %3947 = vmatpush3.msra.mxu0 %v5477_v35 }
  0xab   :  { %3973 = vmatprep.subr.mxu1 %v7791_v46  ;;  %3948 = vmatprep.subr.mxu0 %v5600_v36 }
  0xac   :  { %3974 = vmatpush3.msra.mxu1 %v7792_v21  ;;  %3949 = vmatpush3.msra.mxu0 %v5549_v17 }
  0xad   :  { %3975 = vmatprep.subr.mxu1 %v7793_v29  ;;  %3950 = vmatprep.subr.mxu0 %v5625_v24 }
  0xae   :  { %3976 = vmatpush3.msra.mxu1 %v7794_v22  ;;  %3951 = vmatpush3.msra.mxu0 %v5555_v34 }
  0xaf   :  { %3977 = vmatprep.subr.mxu1 %v7795_v58  ;;  %3952 = vmatprep.subr.mxu0 %v5654_v38 }
  0xb0   :  { %3978 = vmatpush3.msra.mxu1 %v7796_v20  ;;  %3953 = vmatpush3.msra.mxu0 %v5618_v49 }
  0xb1   :  { %3979 = vmatprep.subr.mxu1 %v7797_v5  ;;  %3954 = vmatprep.subr.mxu0 %v5676_v51 }
  0xb2   :  { %3980 = vmatpush3.msra.mxu1 %v7798_v14  ;;  %3955 = vmatpush3.msra.mxu0 %v5660_v54 }
  0xb3   :  { %3981 = vmatprep.subr.mxu1 %v7799_v10  ;;  %3956 = vmatprep.subr.mxu0 %v5692_v27 }
  0xb4   :  { %3982 = vmatpush3.msra.mxu1 %v7800_v13  ;;  %3957 = vmatpush3.msra.mxu0 %v5696_v57  ;;  %v7803_v57 = vld [vmem:[#allocation16_spill] sm:$0xff] }
  0xb5   :  { %3983 = vmatprep.subr.mxu1 %v5502_v59  ;;  %3958 = vmatprep.subr.mxu0 %v5708_v4  ;;  %v7802_v59 = vand.u32 4294901760, %v5229_v47  ;;  %v7805_v4 = vld [vmem:[#allocation30_spill] sm:$0xff]  ;;  %v7808_v47 = vand.u32 4294901760, %v5261_v39  ;;  %v7813_v39 = vand.u32 4294901760, %v5651_v53 }
  0xb6   :  { %3984 = vmatpush3.msra.mxu1 %v5494_v25  ;;  %3959 = vmatpush3.msra.mxu0 %v5712_v50  ;;  %v7804_v25 = vand.u32 4294901760, %v5213_v23  ;;  %v7806_v50 = vand.u32 4294901760, %v5249_v37  ;;  %v7809_v23 = vand.u32 4294901760, %v5267_v0  ;;  %v7812_v37 = vand.u32 4294901760, %v5294_v3 }
  0xb7   :  { %3985 = vmatprep.subr.mxu1 %v5529_v26  ;;  %1507 = vmatprep.mubr.f32.mxu0 %v5640_v11  ;;  %v7815_v0 = vand.u32 4294901760, %v5323_v63  ;;  %v7817_v3 = vand.u32 4294901760, %v7781_v8  ;;  %v52_v63 = vld [vmem:[%s7322_s2 + $0xf8] sm:$0xff] }
  0xb8   :  { %3986 = vmatpush3.msra.mxu1 %v5504_v15  ;;  %1510 = vmatmul.mubr.f32.vlgmr.msra.gmra.mxu0 %v5651_v53  ;;  %v7807_v15 = vand.u32 4294901760, %v5235_v61  ;;  %v7811_v61 = vand.u32 4294901760, %v5640_v11  ;;  %v7821_v53 = vand.u32 4294901760, %v5439_v6  ;;  %v5887_v11 = vand.u32 4294901760, %v52_v63  ;;  %v35_v6 = vld [vmem:[%s7322_s2 + $0x70] sm:$0xff] }
  0xb9   :  { %3987 = vmatprep.subr.mxu1 %v7801_v45  ;;  %3998 = vmatprep.subr.mxu0 %v7802_v59  ;;  %v7823_v59 = vand.u32 4294901760, %v7789_v33 }
  0xba   :  { %3988 = vmatpush3.msra.mxu1 %v7803_v57  ;;  %3999 = vmatpush3.msra.mxu0 %v7804_v25  ;;  %v7810_v25 = vand.u32 4294901760, %v5288_v28  ;;  %v7816_v28 = vand.u32 4294901760, %v5385_v30  ;;  %v51_v30 = vld [vmem:[%s7322_s2 + $0xf0] sm:$0xff]  ;;  %v5926_v33 = vsub.f32 %v52_v63, %v5887_v11 }
  0xbb   :  { %3989 = vmatprep.subr.mxu1 %v7805_v4  ;;  %4000 = vmatprep.subr.mxu0 %v7806_v50  ;;  %v50_v50 = vld [vmem:[%s7322_s2 + $0xe8] sm:$0xff]  ;;  %v5898_v8 = vand.u32 4294901760, %v51_v30 }
  0xbc   :  { %3990 = vmatpush3.msra.mxu1 %v5610_v52  ;;  %4001 = vmatpush3.msra.mxu0 %v7807_v15  ;;  %v7814_v15 = vand.u32 4294901760, %v5334_v43  ;;  %v7818_v43 = vand.u32 4294901760, %v5434_v1  ;;  %v7822_v1 = vand.u32 4294901760, %v5513_v48  ;;  %v7824_v48 = vand.u32 4294901760, %v5569_v56 }
  0xbd   :  { %3991 = vmatprep.subr.mxu1 %v5634_v7  ;;  %4002 = vmatprep.subr.mxu0 %v7808_v47  ;;  %v7826_v56 = vand.u32 4294901760, %v5600_v36  ;;  %v32_v36 = vld [vmem:[%s7322_s2 + $0x58] sm:$0xff]  ;;  %v7832_v47 = vand.u32 4294901760, %v5555_v34  ;;  %v31_v34 = vld [vmem:[%s7322_s2 + $0x50] sm:$0xff] }
  0xbe   :  { %3992 = vmatpush3.msra.mxu1 %v5665_v60  ;;  %4003 = vmatpush3.msra.mxu0 %v7809_v23 }
  0xbf   :  { %3993 = vmatprep.subr.mxu1 %v5672_v42  ;;  %4004 = vmatprep.subr.mxu0 %v7810_v25  ;;  %v5955_v25 = vand.u32 4294901760, %v32_v36 }
  0xc0   :  { %3994 = vmatpush3.msra.mxu1 %v5681_v41  ;;  %1614 = vmatprep.mubr.f32.mxu1 %v7811_v61 }
  0xc1   :  { %4005 = vmatpush3.msra.mxu0 %v7812_v37  ;;  %1618 = vmatmul.mubr.f32.vlgmr.msra.gmra.mxu1 %v7813_v39  ;;  %7835 = vst [vmem:[#allocation17_spill] sm:$0xff] %v5955_v25  ;;  %v7479_v39 = vand.u32 4294901760, %v5926_v33 }
  0xc2   :  { %4006 = vmatprep.subr.mxu0 %v7814_v15  ;;  %4033 = vmatprep.subr.mxu1 %v5191_v16  ;;  %v7819_v16 = vand.u32 4294901760, %v7784_v9  ;;  %v49_v9 = vld [vmem:[%s7322_s2 + $0xe0] sm:$0xff]  ;;  %v7838_v15 = vand.u32 4294901760, %v5676_v51 }
  0xc3   :  { %4007 = vmatpush3.msra.mxu0 %v7815_v0  ;;  %4034 = vmatpush3.msra.mxu1 %v5183_v12  ;;  %v36_v12 = vld [vmem:[%s7322_s2 + $0x78] sm:$0xff] }
  0xc4   :  { %4008 = vmatprep.subr.mxu0 %v7816_v28  ;;  %4035 = vmatprep.subr.mxu1 %v5207_v18  ;;  %v7820_v18 = vand.u32 4294901760, %v5467_v19  ;;  %v5882_v19 = vand.u32 4294901760, %v36_v12 }
  0xc5   :  { %4009 = vmatpush3.msra.mxu0 %v7817_v3  ;;  %4036 = vmatpush3.msra.mxu1 %v7782_v62  ;;  %v7825_v62 = vand.u32 4294901760, %v5477_v35  ;;  %v5917_v35 = vand.u32 4294901760, %v50_v50  ;;  %v7839_v3 = vand.u32 4294901760, %v5660_v54 }
  0xc6   :  { %4010 = vmatprep.subr.mxu0 %v7818_v43  ;;  %4037 = vmatprep.subr.mxu1 %v7783_v44  ;;  %v34_v44 = vld [vmem:[%s7322_s2 + $0x68] sm:$0xff]  ;;  %v5994_v43 = vand.u32 4294901760, %v31_v34 }
  0xc7   :  { %4011 = vmatpush3.msra.mxu0 %v7819_v16  ;;  %4038 = vmatpush3.msra.mxu1 %v7785_v40  ;;  %v5913_v40 = vsub.f32 %v36_v12, %v5882_v19  ;;  %7827 = vst [vmem:[#allocation9_spill] sm:$0xff] %v5917_v35  ;;  %v7842_v16 = vand.u32 4294901760, %v5692_v27  ;;  %v6000_v12 = vsub.f32 %v32_v36, %v5955_v25  ;;  %v7844_v27 = vld [vmem:[#allocation31_spill] sm:$0xff] }
  0xc8   :  { %4012 = vmatprep.subr.mxu0 %v7820_v18  ;;  %4039 = vmatprep.subr.mxu1 %v7786_v2  ;;  %v5915_v2 = vand.u32 4294901760, %v35_v6  ;;  %7841 = vst [vmem:[#allocation5_spill] sm:$0xff] %v5994_v43  ;;  %v46_v18 = vld [vmem:[%s7322_s2 + $0xc8] sm:$0xff]  ;;  %v6042_v36 = vsub.f32 %v31_v34, %v5994_v43 }
  0xc9   :  { %4013 = vmatpush3.msra.mxu0 %v7821_v53  ;;  %4040 = vmatpush3.msra.mxu1 %v7787_v55  ;;  %v33_v55 = vld [vmem:[%s7322_s2 + $0x60] sm:$0xff]  ;;  %v7477_v61 = vand.u32 4294901760, %v5913_v40  ;;  %v7845_v53 = vand.u32 4294901760, %v7844_v27 }
  0xca   :  { %4014 = vmatprep.subr.mxu0 %v7822_v1  ;;  %4041 = vmatprep.subr.mxu1 %v7788_v32  ;;  %v7828_v32 = vand.u32 4294901760, %v5549_v17  ;;  %v48_v17 = vld [vmem:[%s7322_s2 + $0xd8] sm:$0xff]  ;;  %v5953_v23 = vsub.f32 %v35_v6, %v5915_v2  ;;  %v7847_v6 = vld [vmem:[#allocation27_spill] sm:$0xff] }
  0xcb   :  { %4015 = vmatpush3.msra.mxu0 %v7823_v59  ;;  %4042 = vmatpush3.msra.mxu1 %v7790_v31  ;;  %v7829_v31 = vand.u32 4294901760, %v5625_v24  ;;  %v7834_v24 = vand.u32 4294901760, %v5654_v38  ;;  %v7836_v38 = vand.u32 4294901760, %v5618_v49  ;;  %v5970_v37 = vand.u32 4294901760, %v48_v17 }
  0xcc   :  { %4016 = vmatprep.subr.mxu0 %v7824_v48  ;;  %4043 = vmatprep.subr.mxu1 %v7791_v46  ;;  %v5934_v46 = vand.u32 4294901760, %v34_v44  ;;  %v6005_v54 = vsub.f32 %v5913_v40, %v7477_v61  ;;  %v43_v61 = vld [vmem:[%s7322_s2 + $0xb0] sm:$0xff] }
  0xcd   :  { %4017 = vmatpush3.msra.mxu0 %v7825_v62  ;;  %4044 = vmatpush3.msra.mxu1 %v7792_v21  ;;  %v5936_v21 = vand.u32 4294901760, %v49_v9  ;;  %7837 = vst [vmem:[#allocation4_spill] sm:$0xff] %v5970_v37  ;;  %v6023_v59 = vsub.f32 %v48_v17, %v5970_v37  ;;  %v29_v17 = vld [vmem:[%s7322_s2 + $0x40] sm:$0xff] }
  0xce   :  { %4018 = vmatprep.subr.mxu0 %v7826_v56  ;;  %4045 = vmatprep.subr.mxu1 %v7793_v29  ;;  %7830 = vst [vmem:[#allocation15_spill] sm:$0xff] %v5934_v46  ;;  %v5942_v29 = vsub.f32 %v51_v30, %v5898_v8  ;;  %v5977_v0 = vsub.f32 %v34_v44, %v5934_v46 }
  0xcf   :  { %4019 = vmatpush3.msra.mxu0 %v7828_v32  ;;  %4046 = vmatpush3.msra.mxu1 %v7794_v22  ;;  %7831 = vst [vmem:[#allocation3_spill] sm:$0xff] %v5936_v21  ;;  %v5947_v22 = vand.u32 4294901760, %v33_v55  ;;  %v5984_v49 = vsub.f32 %v49_v9, %v5936_v21  ;;  %v6018_v30 = vsub.f32 %v5926_v33, %v7479_v39  ;;  %v45_v9 = vld [vmem:[%s7322_s2 + $0xc0] sm:$0xff] }
  0xd0   :  { %4020 = vmatprep.subr.mxu0 %v7829_v31  ;;  %4047 = vmatprep.subr.mxu1 %v7795_v58  ;;  %v47_v58 = vld [vmem:[%s7322_s2 + $0xd0] sm:$0xff]  ;;  %v7476_v28 = vand.u32 4294901760, %v5942_v29  ;;  %v7472_v44 = vand.u32 4294901760, %v5977_v0  ;;  %v6044_v31 = vand.u32 4294901760, %v46_v18 }
  0xd1   :  { %4021 = vmatpush3.msra.mxu0 %v7832_v47  ;;  %7833 = vst [vmem:[#allocation22_spill] sm:$0xff] %v5947_v22  ;;  %4048 = vmatpush3.msra.mxu1 %v7796_v20  ;;  %v5965_v20 = vsub.f32 %v50_v50, %v5917_v35  ;;  %v5990_v51 = vsub.f32 %v33_v55, %v5947_v22  ;;  %v7848_v50 = vld [vmem:[#allocation32_spill] sm:$0xff]  ;;  %v7471_v56 = vand.u32 4294901760, %v5984_v49  ;;  %v7850_v55 = vld [vmem:[#allocation33_spill] sm:$0xff] }
  0xd2   :  { %4022 = vmatprep.subr.mxu0 %v7834_v24  ;;  %4049 = vmatprep.subr.mxu1 %v7797_v5  ;;  %v30_v5 = vld [vmem:[%s7322_s2 + $0x48] sm:$0xff]  ;;  %v7849_v48 = vand.u32 4294901760, %v7848_v50  ;;  %v6031_v62 = vsub.f32 %v5942_v29, %v7476_v28  ;;  %v7851_v32 = vand.u32 4294901760, %v7850_v55  ;;  %7852 = vst [vmem:[#allocation6_spill] sm:$0xff] %v6044_v31  ;;  %v7480_v50 = vand.u32 4294901760, %v6023_v59 }
  0xd3   :  { %4023 = vmatpush3.msra.mxu0 %v7836_v38  ;;  %4050 = vmatpush3.msra.mxu1 %v7798_v14  ;;  %v5992_v14 = vand.u32 4294901760, %v47_v58  ;;  %v7473_v63 = vand.u32 4294901760, %v5965_v20  ;;  %v6020_v1 = vand.u32 4294901760, %v30_v5  ;;  %v7474_v47 = vand.u32 4294901760, %v5990_v51  ;;  %v7853_v38 = vld [vmem:[#allocation25_spill] sm:$0xff] }
  0xd4   :  { %4024 = vmatprep.subr.mxu0 %v7838_v15  ;;  %4051 = vmatprep.subr.mxu1 %v7799_v10  ;;  %v7475_v10 = vand.u32 4294901760, %v5953_v23  ;;  %v6092_v55 = vand.u32 4294901760, %v29_v17 }
  0xd5   :  { %4025 = vmatpush3.msra.mxu0 %v7839_v3  ;;  %7840 = vst [vmem:[#allocation19_spill] sm:$0xff] %v5992_v14  ;;  %4052 = vmatpush3.msra.mxu1 %v7800_v13  ;;  %v7843_v13 = vld [vmem:[#allocation13_spill] sm:$0xff]  ;;  %7846 = vst [vmem:[#allocation28_spill] sm:$0xff] %v6020_v1  ;;  %v6051_v24 = vsub.f32 %v47_v58, %v5992_v14  ;;  %v6064_v3 = vsub.f32 %v5965_v20, %v7473_v63 }
  0xd6   :  { %4026 = vmatprep.subr.mxu0 %v7842_v16  ;;  %4053 = vmatprep.subr.mxu1 %v7843_v13  ;;  %v6059_v34 = vsub.f32 %v5953_v23, %v7475_v10  ;;  %v7478_v16 = vand.u32 4294901760, %v6000_v12  ;;  %v7855_v58 = vld [vmem:[#allocation29_spill] sm:$0xff]  ;;  %v6071_v27 = vsub.f32 %v30_v5, %v6020_v1  ;;  %v6090_v5 = vsub.f32 %v5984_v49, %v7471_v56  ;;  %v27_v56 = vld [vmem:[%s7322_s2 + $0x30] sm:$0xff] }
  0xd7   :  { %4027 = vmatpush3.msra.mxu0 %v7845_v53  ;;  %4054 = vmatpush3.msra.mxu1 %v7847_v6  ;;  %v6073_v53 = vand.u32 4294901760, %v45_v9  ;;  %v44_v6 = vld [vmem:[%s7322_s2 + $0xb8] sm:$0xff]  ;;  %7858 = vst [vmem:[#allocation11_spill] sm:$0xff] %v6092_v55  ;;  %v6110_v63 = vsub.f32 %v46_v18, %v6044_v31  ;;  %v6128_v18 = vsub.f32 %v6023_v59, %v7480_v50 }
  0xd8   :  { %4028 = vmatprep.subr.mxu0 %v7849_v48  ;;  %4055 = vmatprep.subr.mxu1 %v5529_v26  ;;  %v7854_v26 = vld [vmem:[#allocation14_spill] sm:$0xff]  ;;  %7856 = vst [vmem:[#allocation8_spill] sm:$0xff] %v6071_v27  ;;  %v6116_v10 = vand.u32 4294901760, %v44_v6  ;;  %v6121_v28 = vsub.f32 %v6000_v12, %v7478_v16  ;;  %v26_v16 = vld [vmem:[%s7322_s2 + $0x28] sm:$0xff]  ;;  %v7483_v39 = vand.u32 4294901760, %v6071_v27  ;;  %v6149_v48 = vand.u32 4294901760, %v27_v56 }
  0xd9   :  { %4029 = vmatpush3.msra.mxu0 %v7851_v32  ;;  %1784 = vmatprep.mubr.f32.mxu0 %v7853_v38  ;;  %7857 = vst [vmem:[#allocation7_spill] sm:$0xff] %v6073_v53  ;;  %v28_v32 = vld [vmem:[%s7322_s2 + $0x38] sm:$0xff]  ;;  %7859 = vst [vmem:[#allocation10_spill] sm:$0xff] %v6110_v63 }
  0xda   :  { %4056 = vmatpush3.msra.mxu1 %v7854_v26  ;;  %1786 = vmatmul.mubr.f32.vlgmr.msra.gmra.mxu0 %v7855_v58  ;;  %v7481_v26 = vand.u32 4294901760, %v6051_v24  ;;  %7860 = vst [vmem:[#allocation2_spill] sm:$0xff] %v6116_v10  ;;  %7863 = vst [vmem:[#allocation21_spill] sm:$0xff] %v6149_v48 }
  0xdb   :  { %4057 = vmatprep.subr.mxu1 %v7801_v45  ;;  %4068 = vmatprep.subr.mxu0 %v5887_v11  ;;  %v6085_v45 = vsub.f32 %v5977_v0, %v7472_v44  ;;  %v7482_v44 = vand.u32 4294901760, %v6042_v36 }
  0xdc   :  { %4058 = vmatpush3.msra.mxu1 %v7803_v57  ;;  %4069 = vmatpush3.msra.mxu0 %v5882_v19  ;;  %v6102_v57 = vsub.f32 %v5990_v51, %v7474_v47  ;;  %v6140_v47 = vsub.f32 %v45_v9, %v6073_v53  ;;  %v6157_v15 = vsub.f32 %v6051_v24, %v7481_v26  ;;  %v6176_v9 = vand.u32 4294901760, %v43_v61  ;;  %v41_v26 = vld [vmem:[%s7322_s2 + $0xa0] sm:$0xff] }
  0xdd   :  { %4059 = vmatprep.subr.mxu1 %v7805_v4  ;;  %4070 = vmatprep.subr.mxu0 %v5898_v8  ;;  %v6147_v4 = vsub.f32 %v29_v17, %v6092_v55  ;;  %v42_v17 = vld [vmem:[%s7322_s2 + $0xa8] sm:$0xff] }
  0xde   :  { %4060 = vmatpush3.msra.mxu1 %v5610_v52  ;;  %4071 = vmatpush3.msra.mxu0 %v5915_v2  ;;  %v6130_v52 = vand.u32 4294901760, %v28_v32  ;;  %7862 = vst [vmem:[#allocation23_spill] sm:$0xff] %v6140_v47  ;;  %7865 = vst [vmem:[#allocation26_spill] sm:$0xff] %v6176_v9  ;;  %v6206_v50 = vand.u32 4294901760, %v42_v17 }
  0xdf   :  { %4061 = vmatprep.subr.mxu1 %v5634_v7  ;;  %4072 = vmatprep.subr.mxu0 %v5917_v35  ;;  %v6181_v7 = vsub.f32 %v44_v6, %v6116_v10  ;;  %v7869_v6 = vld [vmem:[#allocation24_spill] sm:$0xff] }
  0xe0   :  { %7861 = vst [vmem:[#allocation20_spill] sm:$0xff] %v6130_v52  ;;  %4062 = vmatpush3.msra.mxu1 %v5665_v60  ;;  %4073 = vmatpush3.msra.mxu0 %v5934_v46  ;;  %v6162_v60 = vsub.f32 %v6042_v36, %v7482_v44  ;;  %v6178_v44 = vand.u32 4294901760, %v26_v16  ;;  %v6187_v13 = vsub.f32 %v28_v32, %v6130_v52  ;;  %7868 = vst [vmem:[#allocation30_spill] sm:$0xff] %v6206_v50  ;;  %v23_v35 = vld [vmem:[%s7322_s2 + $0x10] sm:$0xff] }
  0xe1   :  { %4063 = vmatprep.subr.mxu1 %v5672_v42  ;;  %v6171_v42 = vld [vmem:[%s7323_s0] sm:$0xf]  ;;  %4074 = vmatprep.subr.mxu0 %v5936_v21  ;;  %7867 = vst [vmem:[#allocation16_spill] sm:$0xff] %v6181_v7  ;;  %v6204_v32 = vsub.f32 %v27_v56, %v6149_v48  ;;  %v7870_v21 = vsub.s32 1, %v7869_v6  ;;  %v6237_v56 = vand.u32 4294901760, %v41_v26 }
  0xe2   :  { %7864 = vst [vmem:[#allocation12_spill] sm:$0xff] %v6171_v42  ;;  %4064 = vmatpush3.msra.mxu1 %v5681_v41  ;;  %7866 = vst [vmem:[#allocation18_spill] sm:$0xff] %v6178_v44  ;;  %1888 = vmatprep.mubr.f32.mxu1 %v7853_v38  ;;  %v6192_v41 = vsub.f32 %v6071_v27, %v7483_v39  ;;  %v25_v38 = vld [vmem:[%s7322_s2 + $0x20] sm:$0xff]  ;;  %v7871_v27 = vand.u32 4294901760, %v6018_v30 }
  0xe3   :  { %4075 = vmatpush3.msra.mxu0 %v5947_v22  ;;  %1890 = vmatmul.mubr.f32.vlgmr.msra.gmra.mxu1 %v7855_v58  ;;  %v24_v22 = vld [vmem:[%s7322_s2 + $0x18] sm:$0xff]  ;;  %v1903_v46 = vrot.slane %v6171_v42, %v7870_v21  ;;  %v7873_v21 = vsub.s32 0, %v7869_v6  ;;  %v6235_v58 = vsub.f32 %v26_v16, %v6178_v44  ;;  %v7877_v16 = vand.u32 4294901760, %v6140_v47 }
  0xe4   :  { %4076 = vmatprep.subr.mxu0 %v5970_v37  ;;  %4103 = vmatprep.subr.mxu1 %v7871_v27  ;;  %v7872_v37 = vand.u32 4294901760, %v6110_v63  ;;  %v7874_v27 = vand.u32 4294901760, %v6005_v54  ;;  %v6260_v6 = vsub.f32 %v43_v61, %v6176_v9 }
  0xe5   :  { %4077 = vmatpush3.msra.mxu0 %v5955_v25  ;;  %v1899_v30 = vrot.slane %v6171_v42, %v7873_v21  ;;  %v40_v25 = vld [vmem:[%s7322_s2 + $0x98] sm:$0xff]  ;;  %v7876_v21 = vand.u32 4294901760, %v6031_v62  ;;  %v6254_v42 = vand.u32 4294901760, %v24_v22  ;;  %v7879_v62 = vand.u32 4294901760, %v6059_v34 }
  0xe6   :  { %v6223_v39 = vsub.f32 %v6110_v63, %v7872_v37  ;;  %4104 = vmatpush3.msra.mxu1 %v7874_v27  ;;  %4078 = vmatprep.subr.mxu0 %v5992_v14  ;;  %v6239_v37 = vand.u32 4294901760, %v25_v38  ;;  %v6252_v27 = vsub.f32 %v6140_v47, %v7877_v16  ;;  %v39_v14 = vld [vmem:[%s7322_s2 + $0x90] sm:$0xff]  ;;  %v6273_v47 = vand.u32 4294901760, %v1903_v46 }
  0xe7   :  { %4105 = vmatprep.subr.mxu1 %v7876_v21  ;;  %4079 = vmatpush3.msra.mxu0 %v5994_v43  ;;  %7878 = vst [vmem:[#allocation31_spill] sm:$0xff] %v6254_v42  ;;  %v7880_v21 = vand.u32 4294901760, %v6147_v4  ;;  %v6271_v43 = vand.u32 4294901760, %v23_v35  ;;  %v7882_v63 = vand.u32 4294901760, %v6064_v3  ;;  %v6279_v34 = vand.u32 4294901760, %v40_v25 }
  0xe8   :  { %7875 = vst [vmem:[#allocation13_spill] sm:$0xff] %v6239_v37  ;;  %4106 = vmatpush3.msra.mxu1 %v7879_v62  ;;  %4080 = vmatprep.subr.mxu0 %v6044_v31  ;;  %7881 = vst [vmem:[#allocation27_spill] sm:$0xff] %v6273_v47  ;;  %v2187_v61 = vand.u32 4294901760, %v6223_v39  ;;  %v6282_v62 = vsub.f32 %v42_v17, %v6206_v50  ;;  %v7885_v16 = vand.u32 4294901760, %v6085_v45  ;;  %v6297_v39 = vand.u32 4294901760, %v39_v14  ;;  %v22_v17 = vld [vmem:[%s7322_s2 + $0x8] sm:$0xff] }
  0xe9   :  { %v6268_v54 = vsub.f32 %v6147_v4, %v7880_v21  ;;  %4107 = vmatprep.subr.mxu1 %v7882_v63  ;;  %4081 = vmatpush3.msra.mxu0 %v6020_v1  ;;  %7883 = vst [vmem:[#allocation32_spill] sm:$0xff] %v6279_v34  ;;  %v6284_v21 = vand.u32 4294901760, %v1899_v30  ;;  %v6290_v31 = vsub.f32 %v25_v38, %v6239_v37  ;;  %v7886_v63 = vand.u32 4294901760, %v6181_v7  ;;  %v38_v1 = vld [vmem:[%s7322_s2 + $0x88] sm:$0xff] }
  0xea   :  { %4108 = vmatpush3.msra.mxu1 %v7885_v16  ;;  %4082 = vmatprep.subr.mxu0 %v6073_v53  ;;  %7887 = vst [vmem:[#allocation25_spill] sm:$0xff] %v6297_v39  ;;  %v7888_v45 = vand.u32 4294901760, %v6090_v5  ;;  %v2194_v38 = vand.u32 4294901760, %v6252_v27  ;;  %v6308_v16 = vsub.f32 %v24_v22, %v6254_v42  ;;  %v6315_v53 = vsub.f32 %v41_v26, %v6237_v56 }
  0xeb   :  { %7884 = vst [vmem:[#allocation33_spill] sm:$0xff] %v6284_v21  ;;  %v6295_v3 = vsub.f32 %v6181_v7, %v7886_v63  ;;  %4083 = vmatpush3.msra.mxu0 %v6092_v55  ;;  %v7889_v7 = vand.u32 4294901760, %v6102_v57  ;;  %v2082_v5 = vand.u32 4294901760, %v6268_v54  ;;  %v7890_v27 = vand.u32 4294901760, %v6187_v13  ;;  %v37_v63 = vld [vmem:[%s7322_s2 + $0x80] sm:$0xff]  ;;  %2253 = vmatprep.mubr.f32.mxu1 %v6273_v47 }
  0xec   :  { %4109 = vmatprep.subr.mxu1 %v7888_v45  ;;  %4084 = vmatprep.subr.mxu0 %v6116_v10  ;;  %v6325_v45 = vsub.f32 %v23_v35, %v6271_v43  ;;  %v6331_v26 = vsub.f32 %v1903_v46, %v6273_v47  ;;  %v7891_v57 = vand.u32 4294901760, %v6128_v18  ;;  %v21_v35 = vld [vmem:[%s7322_s2] sm:$0xff]  ;;  %v6346_v10 = vsub.f32 %v40_v25, %v6279_v34 }
  0xed   :  { %4110 = vmatpush3.msra.mxu1 %v7889_v7  ;;  %v2088_v22 = vsub.f32 %v6187_v13, %v7890_v27  ;;  %4085 = vmatpush3.msra.mxu0 %v6130_v52  ;;  %v6336_v7 = vand.u32 4294901760, %v38_v1  ;;  %v6343_v27 = vsub.f32 %v1899_v30, %v6284_v21  ;;  %v7892_v46 = vand.u32 4294901760, %v6121_v28 }
  0xee   :  { %4111 = vmatprep.subr.mxu1 %v7891_v57  ;;  %4086 = vmatprep.subr.mxu0 %v6176_v9  ;;  %v2201_v18 = vand.u32 4294901760, %v6295_v3  ;;  %v7893_v57 = vand.u32 4294901760, %v6204_v32  ;;  %v6355_v52 = vand.u32 4294901760, %v22_v17  ;;  %v7894_v30 = vand.u32 4294901760, %v6157_v15 }
  0xef   :  { %4112 = vmatpush3.msra.mxu1 %v7892_v46  ;;  %4087 = vmatpush3.msra.mxu0 %v6149_v48  ;;  %v7895_v25 = vand.u32 4294901760, %v6260_v6  ;;  %v6364_v46 = vand.u32 4294901760, %v37_v63  ;;  %v6368_v9 = vsub.f32 %v39_v14, %v6297_v39  ;;  %v2089_v15 = vand.u32 4294901760, %v2088_v22 }
  0xf0   :  { %v2095_v54 = vsub.f32 %v6204_v32, %v7893_v57  ;;  %4113 = vmatprep.subr.mxu1 %v7894_v30  ;;  %v7896_v57 = vand.u32 4294901760, %v6162_v60  ;;  %4088 = vmatprep.subr.mxu0 %v6206_v50  ;;  %v6373_v30 = vand.u32 4294901760, %v21_v35  ;;  %v7898_v22 = vand.u32 4294901760, %v6192_v41  ;;  %v7934_v47 = vld [vmem:[#allocation32_spill] sm:$0xff] }
  0xf1   :  { %v2207_v28 = vsub.f32 %v6260_v6, %v7895_v25  ;;  %4089 = vmatpush3.msra.mxu0 %v6178_v44  ;;  %v7897_v25 = vand.u32 4294901760, %v6282_v62  ;;  %v7900_v55 = vand.u32 4294901760, %v6235_v58  ;;  %v7901_v60 = vand.u32 4294901760, %v6315_v53 }
  0xf2   :  { %4114 = vmatpush3.msra.mxu1 %v7896_v57  ;;  %v6384_v57 = vsub.f32 %v38_v1, %v6336_v7  ;;  %4090 = vmatprep.subr.mxu0 %v6237_v56  ;;  %v2096_v48 = vand.u32 4294901760, %v2095_v54  ;;  %v6402_v54 = vsub.f32 %v37_v63, %v6364_v46 }
  0xf3   :  { %4115 = vmatprep.subr.mxu1 %v2187_v61  ;;  %v2214_v14 = vsub.f32 %v6282_v62, %v7897_v25  ;;  %v6390_v61 = vsub.f32 %v22_v17, %v6355_v52  ;;  %v2102_v25 = vsub.f32 %v6235_v58, %v7900_v55  ;;  %4091 = vmatpush3.msra.mxu0 %v6239_v37  ;;  %v2208_v1 = vand.u32 4294901760, %v2207_v28 }
  0xf4   :  { %4116 = vmatpush3.msra.mxu1 %v7898_v22  ;;  %v2221_v41 = vsub.f32 %v6315_v53, %v7901_v60  ;;  %7902 = vst [vmem:[#allocation29_spill] sm:$0xff] %v6402_v54  ;;  %4092 = vmatprep.subr.mxu0 %v6279_v34  ;;  %v6406_v55 = vsub.f32 %v21_v35, %v6373_v30  ;;  %v7904_v17 = vand.u32 4294901760, %v6331_v26  ;;  %v7905_v28 = vand.u32 4294901760, %v6290_v31 }
  0xf5   :  { %7899 = vst [vmem:[#allocation14_spill] sm:$0xff] %v6390_v61  ;;  %4117 = vmatprep.subr.mxu1 %v2194_v38  ;;  %4093 = vmatpush3.msra.mxu0 %v6254_v42  ;;  %v2215_v63 = vand.u32 4294901760, %v2214_v14  ;;  %v7907_v35 = vand.u32 4294901760, %v6346_v10  ;;  %v7908_v60 = vand.u32 4294901760, %v6308_v16  ;;  %v7909_v42 = vand.u32 4294901760, %v6368_v9 }
  0xf6   :  { %4118 = vmatpush3.msra.mxu1 %v2082_v5  ;;  %7903 = vst [vmem:[#allocation34_spill] sm:$0xff] %v6406_v55  ;;  %v2015_v38 = vsub.f32 %v6331_v26, %v7904_v17  ;;  %v2109_v3 = vsub.f32 %v6290_v31, %v7905_v28  ;;  %v7906_v5 = vand.u32 4294901760, %v6343_v27  ;;  %4094 = vmatprep.subr.mxu0 %v6297_v39  ;;  %v2103_v28 = vand.u32 4294901760, %v2102_v25 }
  0xf7   :  { %4119 = vmatprep.subr.mxu1 %v2201_v18  ;;  %v2228_v34 = vsub.f32 %v6346_v10, %v7907_v35  ;;  %v2116_v18 = vsub.f32 %v6308_v16, %v7908_v60  ;;  %4095 = vmatpush3.msra.mxu0 %v6271_v43  ;;  %v2235_v35 = vsub.f32 %v6368_v9, %v7909_v42  ;;  %v7910_v39 = vand.u32 4294901760, %v6325_v45 }
  0xf8   :  { %v2021_v22 = vsub.f32 %v6343_v27, %v7906_v5  ;;  %4120 = vmatpush3.msra.mxu1 %v2089_v15  ;;  %v2222_v5 = vand.u32 4294901760, %v2221_v41  ;;  %4096 = vmatprep.subr.mxu0 %v6336_v7  ;;  %v2016_v15 = vand.u32 4294901760, %v2015_v38  ;;  %v2110_v25 = vand.u32 4294901760, %v2109_v3 }
  0xf9   :  { %4121 = vmatprep.subr.mxu1 %v2208_v1  ;;  %v2123_v60 = vsub.f32 %v6325_v45, %v7910_v39  ;;  %v7533_v1 = vand.u32 4294901760, %v6406_v55  ;;  %4097 = vmatpush3.msra.mxu0 %v6355_v52  ;;  %v2229_v14 = vand.u32 4294901760, %v2228_v34  ;;  %v7911_v42 = vand.u32 4294901760, %v6384_v57 }
  0xfa   :  { %4122 = vmatpush3.msra.mxu1 %v2096_v48  ;;  %v2022_v41 = vand.u32 4294901760, %v2021_v22  ;;  %4098 = vmatprep.subr.mxu0 %v6364_v46  ;;  %v2117_v48 = vand.u32 4294901760, %v2116_v18  ;;  %v7912_v3 = vand.u32 4294901760, %v6390_v61  ;;  %v2236_v39 = vand.u32 4294901760, %v2235_v35 }
  0xfb   :  { %4123 = vmatprep.subr.mxu1 %v2215_v63  ;;  %v2242_v17 = vsub.f32 %v6384_v57, %v7911_v42  ;;  %4099 = vmatpush3.msra.mxu0 %v6373_v30  ;;  %v7913_v63 = vand.u32 4294901760, %v6402_v54  ;;  %v2124_v22 = vand.u32 4294901760, %v2123_v60  ;;  %v7917_v60 = vld [vmem:[#allocation15_spill] sm:$0xff] }
  0xfc   :  { %4124 = vmatpush3.msra.mxu1 %v2103_v28  ;;  %v2130_v38 = vsub.f32 %v6390_v61, %v7912_v3  ;;  %2017 = vmatprep.mubr.f32.mxu0 %v2016_v15  ;;  %v2137_v28 = vsub.f32 %v6406_v55, %v7533_v1  ;;  %v7919_v42 = vld [vmem:[#allocation3_spill] sm:$0xff]  ;;  %v7921_v3 = vld [vmem:[#allocation16_spill] sm:$0xff]  ;;  %v7932_v1 = vld [vmem:[#allocation26_spill] sm:$0xff] }
  0xfd   :  { %4125 = vmatprep.subr.mxu1 %v2222_v5  ;;  %v2249_v34 = vsub.f32 %v6402_v54, %v7913_v63  ;;  %2023 = vmatmul.mubr.f32.vlgmr.msra.gmra.mxu0 %v2022_v41  ;;  %v2243_v18 = vand.u32 4294901760, %v2242_v17  ;;  %v7914_v17 = vld [vmem:[#allocation10_spill] sm:$0xff]  ;;  %v7918_v41 = vld [vmem:[#allocation23_spill] sm:$0xff] }
  0xfe   :  { %4126 = vmatpush3.msra.mxu1 %v2110_v25  ;;  %4138 = vmatprep.subr.mxu0 %v5926_v33  ;;  %v2131_v5 = vand.u32 4294901760, %v2130_v38  ;;  %v2138_v15 = vand.u32 4294901760, %v2137_v28  ;;  %v7916_v25 = vld [vmem:[#allocation8_spill] sm:$0xff]  ;;  %v7924_v63 = vld [vmem:[#allocation19_spill] sm:$0xff] }
  0xff   :  { %4127 = vmatprep.subr.mxu1 %v2229_v14  ;;  %4139 = vmatpush3.msra.mxu0 %v5913_v40  ;;  %v2250_v35 = vand.u32 4294901760, %v2249_v34  ;;  %v7915_v14 = vld [vmem:[#allocation9_spill] sm:$0xff]  ;;  %v7922_v38 = vld [vmem:[#allocation4_spill] sm:$0xff] }
 0x100   :  { %4128 = vmatpush3.msra.mxu1 %v2117_v48  ;;  %4140 = vmatprep.subr.mxu0 %v5942_v29  ;;  %v7920_v48 = vld [vmem:[#allocation22_spill] sm:$0xff]  ;;  %v7925_v34 = vld [vmem:[#allocation5_spill] sm:$0xff]  ;;  %v7927_v28 = vld [vmem:[#allocation28_spill] sm:$0xff] }
 0x101   :  { %4129 = vmatprep.subr.mxu1 %v2236_v39  ;;  %4141 = vmatpush3.msra.mxu0 %v5953_v23  ;;  %v7923_v39 = vld [vmem:[#allocation17_spill] sm:$0xff] }
 0x102   :  { %4130 = vmatpush3.msra.mxu1 %v2124_v22  ;;  %4142 = vmatprep.subr.mxu0 %v5965_v20  ;;  %v7926_v22 = vld [vmem:[#allocation6_spill] sm:$0xff] }
 0x103   :  { %4131 = vmatprep.subr.mxu1 %v2243_v18  ;;  %4143 = vmatpush3.msra.mxu0 %v5977_v0  ;;  %v7928_v18 = vld [vmem:[#allocation7_spill] sm:$0xff] }
 0x104   :  { %4132 = vmatpush3.msra.mxu1 %v2131_v5  ;;  %4144 = vmatprep.subr.mxu0 %v5984_v49  ;;  %v7929_v5 = vld [vmem:[#allocation11_spill] sm:$0xff] }
 0x105   :  { %4133 = vmatprep.subr.mxu1 %v2250_v35  ;;  %4145 = vmatpush3.msra.mxu0 %v5990_v51  ;;  %v7930_v35 = vld [vmem:[#allocation2_spill] sm:$0xff] }
 0x106   :  { %4134 = vmatpush3.msra.mxu1 %v2138_v15  ;;  %4146 = vmatprep.subr.mxu0 %v6023_v59  ;;  %v7931_v15 = vld [vmem:[#allocation20_spill] sm:$0xff] }
 0x107   :  { %2255 = vmatmul.mubr.f32.vlgmr.msra.gmra.mxu1 %v6284_v21  ;;  %4173 = vmatprep.subr.mxu1 %v5887_v11  ;;  %v7933_v21 = vld [vmem:[#allocation21_spill] sm:$0xff] }
 0x108   :  { %4147 = vmatpush3.msra.mxu0 %v6000_v12  ;;  %4174 = vmatpush3.msra.mxu1 %v5882_v19 }
 0x109   :  { %4148 = vmatprep.subr.mxu0 %v6051_v24  ;;  %4175 = vmatprep.subr.mxu1 %v5898_v8 }
 0x10a   :  { %4149 = vmatpush3.msra.mxu0 %v6042_v36  ;;  %4176 = vmatpush3.msra.mxu1 %v5915_v2 }
 0x10b   :  { %4150 = vmatprep.subr.mxu0 %v7914_v17  ;;  %4177 = vmatprep.subr.mxu1 %v7915_v14 }
 0x10c   :  { %4151 = vmatpush3.msra.mxu0 %v7916_v25  ;;  %4178 = vmatpush3.msra.mxu1 %v7917_v60 }
 0x10d   :  { %4152 = vmatprep.subr.mxu0 %v7918_v41  ;;  %4179 = vmatprep.subr.mxu1 %v7919_v42 }
 0x10e   :  { %4153 = vmatpush3.msra.mxu0 %v6147_v4  ;;  %4180 = vmatpush3.msra.mxu1 %v7920_v48 }
 0x10f   :  { %4154 = vmatprep.subr.mxu0 %v7921_v3  ;;  %4181 = vmatprep.subr.mxu1 %v7922_v38 }
 0x110   :  { %4155 = vmatpush3.msra.mxu0 %v6187_v13  ;;  %4182 = vmatpush3.msra.mxu1 %v7923_v39 }
 0x111   :  { %4156 = vmatprep.subr.mxu0 %v6260_v6  ;;  %4183 = vmatprep.subr.mxu1 %v7924_v63 }
 0x112   :  { %4157 = vmatpush3.msra.mxu0 %v6204_v32  ;;  %4184 = vmatpush3.msra.mxu1 %v7925_v34 }
 0x113   :  { %4158 = vmatprep.subr.mxu0 %v6282_v62  ;;  %4185 = vmatprep.subr.mxu1 %v7926_v22 }
 0x114   :  { %4159 = vmatpush3.msra.mxu0 %v6235_v58  ;;  %4186 = vmatpush3.msra.mxu1 %v7927_v28 }
 0x115   :  { %4160 = vmatprep.subr.mxu0 %v6315_v53  ;;  %4187 = vmatprep.subr.mxu1 %v7928_v18 }
 0x116   :  { %4161 = vmatpush3.msra.mxu0 %v6290_v31  ;;  %4188 = vmatpush3.msra.mxu1 %v7929_v5 }
 0x117   :  { %4162 = vmatprep.subr.mxu0 %v6346_v10  ;;  %4189 = vmatprep.subr.mxu1 %v7930_v35 }
 0x118   :  { %4163 = vmatpush3.msra.mxu0 %v6308_v16  ;;  %4190 = vmatpush3.msra.mxu1 %v7931_v15 }
 0x119   :  { %4164 = vmatprep.subr.mxu0 %v6368_v9  ;;  %4191 = vmatprep.subr.mxu1 %v7932_v1 }
 0x11a   :  { %4165 = vmatpush3.msra.mxu0 %v6325_v45  ;;  %4192 = vmatpush3.msra.mxu1 %v7933_v21 }
 0x11b   :  { %4166 = vmatprep.subr.mxu0 %v6384_v57  ;;  %4193 = vmatprep.subr.mxu1 %v6206_v50  ;;  %v7935_v50 = vand.u32 4294901760, %v5926_v33  ;;  %v7941_v33 = vand.u32 4294901760, %v5965_v20  ;;  %v7946_v20 = vand.u32 4294901760, %v6343_v27 }
 0x11c   :  { %4167 = vmatpush3.msra.mxu0 %v6390_v61  ;;  %4194 = vmatpush3.msra.mxu1 %v6178_v44  ;;  %v7936_v61 = vld [vmem:[#allocation31_spill] sm:$0xff]  ;;  %v7937_v44 = vand.u32 4294901760, %v5913_v40  ;;  %v7942_v40 = vand.u32 4294901760, %v5977_v0  ;;  %v7948_v0 = vand.u32 4294901760, %v6000_v12 }
 0x11d   :  { %4168 = vmatprep.subr.mxu0 %v6402_v54  ;;  %4195 = vmatprep.subr.mxu1 %v6237_v56  ;;  %v7938_v54 = vld [vmem:[#allocation25_spill] sm:$0xff] }
 0x11e   :  { %4169 = vmatpush3.msra.mxu0 %v6406_v55  ;;  %2390 = vmatprep.mubr.f32.mxu0 %v6331_v26  ;;  %v7939_v55 = vand.u32 4294901760, %v5942_v29  ;;  %v7943_v29 = vand.u32 4294901760, %v5984_v49  ;;  %v7949_v49 = vand.u32 4294901760, %v6051_v24  ;;  %v7955_v24 = vand.u32 4294901760, %v7921_v3 }
 0x11f   :  { %4196 = vmatpush3.msra.mxu1 %v6239_v37  ;;  %2393 = vmatmul.mubr.f32.vlgmr.msra.gmra.mxu0 %v6343_v27  ;;  %v7940_v37 = vand.u32 4294901760, %v5953_v23  ;;  %v7944_v23 = vand.u32 4294901760, %v6331_v26  ;;  %v67_v26 = vld [vmem:[%s7322_s2 + $0x170] sm:$0xff]  ;;  %v7957_v27 = vand.u32 4294901760, %v6260_v6  ;;  %v7959_v6 = vand.u32 4294901760, %v6282_v62  ;;  %v64_v62 = vld [vmem:[%s7322_s2 + $0x158] sm:$0xff] }
 0x120   :  { %4197 = vmatprep.subr.mxu1 %v7934_v47  ;;  %4208 = vmatprep.subr.mxu0 %v7935_v50  ;;  %v7947_v50 = vand.u32 4294901760, %v6023_v59  ;;  %v7951_v59 = vand.u32 4294901760, %v7914_v17  ;;  %v7958_v17 = vand.u32 4294901760, %v6204_v32  ;;  %v81_v32 = vld [vmem:[%s7322_s2 + $0x1e0] sm:$0xff] }
 0x121   :  { %4198 = vmatpush3.msra.mxu1 %v7936_v61  ;;  %4209 = vmatpush3.msra.mxu0 %v7937_v44  ;;  %v7945_v44 = vand.u32 4294901760, %v5990_v51  ;;  %v7950_v51 = vand.u32 4294901760, %v6042_v36  ;;  %v68_v36 = vld [vmem:[%s7322_s2 + $0x178] sm:$0xff] }
 0x122   :  { %4199 = vmatprep.subr.mxu1 %v7938_v54  ;;  %4210 = vmatprep.subr.mxu0 %v7939_v55  ;;  %v6587_v55 = vand.u32 4294901760, %v68_v36 }
 0x123   :  { %4200 = vmatpush3.msra.mxu1 %v6271_v43  ;;  %4211 = vmatpush3.msra.mxu0 %v7940_v37  ;;  %v7956_v37 = vand.u32 4294901760, %v6187_v13  ;;  %v82_v13 = vld [vmem:[%s7322_s2 + $0x1e8] sm:$0xff] }
 0x124   :  { %4201 = vmatprep.subr.mxu1 %v6336_v7  ;;  %4212 = vmatprep.subr.mxu0 %v7941_v33  ;;  %v6617_v3 = vand.u32 4294901760, %v82_v13  ;;  %v63_v33 = vld [vmem:[%s7322_s2 + $0x150] sm:$0xff] }
 0x125   :  { %4202 = vmatpush3.msra.mxu1 %v6355_v52  ;;  %4213 = vmatpush3.msra.mxu0 %v7942_v40  ;;  %v7967_v40 = vand.u32 4294901760, %v6346_v10 }
 0x126   :  { %4203 = vmatprep.subr.mxu1 %v6364_v46  ;;  %4214 = vmatprep.subr.mxu0 %v7943_v29  ;;  %7961 = vst [vmem:[#allocation10_spill] sm:$0xff] %v6617_v3  ;;  %v79_v29 = vld [vmem:[%s7322_s2 + $0x1d0] sm:$0xff]  ;;  %v6664_v10 = vsub.f32 %v82_v13, %v6617_v3 }
 0x127   :  { %4204 = vmatpush3.msra.mxu1 %v6373_v30  ;;  %2497 = vmatprep.mubr.f32.mxu1 %v7944_v23 }
 0x128   :  { %4215 = vmatpush3.msra.mxu0 %v7945_v44  ;;  %2501 = vmatmul.mubr.f32.vlgmr.msra.gmra.mxu1 %v7946_v20  ;;  %v7969_v44 = vand.u32 4294901760, %v6308_v16  ;;  %v7971_v20 = vand.u32 4294901760, %v6368_v9  ;;  %v78_v16 = vld [vmem:[%s7322_s2 + $0x1c8] sm:$0xff] }
 0x129   :  { %4216 = vmatprep.subr.mxu0 %v7947_v50  ;;  %4243 = vmatprep.subr.mxu1 %v5887_v11  ;;  %v84_v11 = vld [vmem:[%s7322_s2 + $0x1f8] sm:$0xff] }
 0x12a   :  { %4217 = vmatpush3.msra.mxu0 %v7948_v0  ;;  %4244 = vmatpush3.msra.mxu1 %v5882_v19  ;;  %v7952_v19 = vand.u32 4294901760, %v7916_v25  ;;  %v6567_v12 = vand.u32 4294901760, %v84_v11 }
 0x12b   :  { %4218 = vmatprep.subr.mxu0 %v7949_v49  ;;  %4245 = vmatprep.subr.mxu1 %v5898_v8  ;;  %v7953_v8 = vand.u32 4294901760, %v7918_v41  ;;  %v6606_v41 = vand.u32 4294901760, %v67_v26  ;;  %v6673_v49 = vand.u32 4294901760, %v63_v33 }
 0x12c   :  { %4219 = vmatpush3.msra.mxu0 %v7950_v51  ;;  %4246 = vmatpush3.msra.mxu1 %v5915_v2  ;;  %v7954_v2 = vand.u32 4294901760, %v6147_v4  ;;  %v83_v4 = vld [vmem:[%s7322_s2 + $0x1f0] sm:$0xff]  ;;  %v6599_v25 = vsub.f32 %v84_v11, %v6567_v12  ;;  %v6689_v51 = vand.u32 4294901760, %v79_v29 }
 0x12d   :  { %4220 = vmatprep.subr.mxu0 %v7951_v59  ;;  %4247 = vmatprep.subr.mxu1 %v7915_v14  ;;  %v66_v14 = vld [vmem:[%s7322_s2 + $0x168] sm:$0xff]  ;;  %7972 = vst [vmem:[#allocation22_spill] sm:$0xff] %v6673_v49 }
 0x12e   :  { %4221 = vmatpush3.msra.mxu0 %v7952_v19  ;;  %4248 = vmatpush3.msra.mxu1 %v7917_v60  ;;  %v6604_v60 = vand.u32 4294901760, %v83_v4  ;;  %7974 = vst [vmem:[#allocation16_spill] sm:$0xff] %v6689_v51  ;;  %v62_v59 = vld [vmem:[%s7322_s2 + $0x148] sm:$0xff] }
 0x12f   :  { %4222 = vmatprep.subr.mxu0 %v7953_v8  ;;  %4249 = vmatprep.subr.mxu1 %v7919_v42  ;;  %v65_v42 = vld [vmem:[%s7322_s2 + $0x160] sm:$0xff] }
 0x130   :  { %4223 = vmatpush3.msra.mxu0 %v7954_v2  ;;  %4250 = vmatpush3.msra.mxu1 %v7920_v48  ;;  %v7960_v48 = vand.u32 4294901760, %v6235_v58  ;;  %v80_v58 = vld [vmem:[%s7322_s2 + $0x1d8] sm:$0xff]  ;;  %v6656_v23 = vsub.f32 %v83_v4, %v6604_v60  ;;  %v7976_v2 = vld [vmem:[#allocation30_spill] sm:$0xff]  ;;  %v7546_v4 = vand.u32 4294901760, %v6664_v10 }
 0x131   :  { %4224 = vmatprep.subr.mxu0 %v7955_v24  ;;  %4251 = vmatprep.subr.mxu1 %v7922_v38  ;;  %v7962_v38 = vand.u32 4294901760, %v6315_v53  ;;  %v7553_v53 = vand.u32 4294901760, %v6599_v25 }
 0x132   :  { %4225 = vmatpush3.msra.mxu0 %v7956_v37  ;;  %4252 = vmatpush3.msra.mxu1 %v7923_v39  ;;  %v6626_v39 = vsub.f32 %v68_v36, %v6587_v55  ;;  %v7550_v19 = vand.u32 4294901760, %v6656_v23  ;;  %v7977_v36 = vld [vmem:[#allocation14_spill] sm:$0xff]  ;;  %v6708_v37 = vand.u32 4294901760, %v78_v16 }
 0x133   :  { %4226 = vmatprep.subr.mxu0 %v7957_v27  ;;  %4253 = vmatprep.subr.mxu1 %v7924_v63  ;;  %v6628_v63 = vand.u32 4294901760, %v66_v14  ;;  %v6687_v9 = vsub.f32 %v6599_v25, %v7553_v53  ;;  %v7978_v24 = vand.u32 4294901760, %v7977_v36  ;;  %v7981_v27 = vld [vmem:[#allocation29_spill] sm:$0xff]  ;;  %v6766_v36 = vsub.f32 %v6664_v10, %v7546_v4  ;;  %v58_v53 = vld [vmem:[%s7322_s2 + $0x128] sm:$0xff] }
 0x134   :  { %4227 = vmatpush3.msra.mxu0 %v7958_v17  ;;  %4254 = vmatpush3.msra.mxu1 %v7925_v34  ;;  %v7964_v34 = vand.u32 4294901760, %v6290_v31  ;;  %v6650_v31 = vand.u32 4294901760, %v64_v62  ;;  %v7552_v0 = vand.u32 4294901760, %v6626_v39  ;;  %7979 = vst [vmem:[#allocation4_spill] sm:$0xff] %v6708_v37  ;;  %v7982_v13 = vand.u32 4294901760, %v7981_v27 }
 0x135   :  { %4228 = vmatprep.subr.mxu0 %v7959_v6  ;;  %4255 = vmatprep.subr.mxu1 %v7926_v22  ;;  %7963 = vst [vmem:[#allocation9_spill] sm:$0xff] %v6628_v63  ;;  %v6636_v22 = vand.u32 4294901760, %v81_v32  ;;  %v6670_v50 = vsub.f32 %v66_v14, %v6628_v63  ;;  %v6726_v14 = vsub.f32 %v63_v33, %v6673_v49  ;;  %v6728_v6 = vand.u32 4294901760, %v62_v59 }
 0x136   :  { %4229 = vmatpush3.msra.mxu0 %v7960_v48  ;;  %4256 = vmatpush3.msra.mxu1 %v7927_v28  ;;  %v6638_v28 = vand.u32 4294901760, %v65_v42  ;;  %7968 = vst [vmem:[#allocation23_spill] sm:$0xff] %v6650_v31  ;;  %v6723_v17 = vsub.f32 %v6626_v39, %v7552_v0  ;;  %v7984_v48 = vld [vmem:[#allocation34_spill] sm:$0xff]  ;;  %v6741_v33 = vsub.f32 %v79_v29, %v6689_v51  ;;  %v76_v29 = vld [vmem:[%s7322_s2 + $0x1b8] sm:$0xff] }
 0x137   :  { %4230 = vmatprep.subr.mxu0 %v7962_v38  ;;  %4257 = vmatprep.subr.mxu1 %v7928_v18  ;;  %7965 = vst [vmem:[#allocation8_spill] sm:$0xff] %v6636_v22  ;;  %v6648_v18 = vsub.f32 %v67_v26, %v6606_v41  ;;  %v6695_v11 = vsub.f32 %v81_v32, %v6636_v22  ;;  %v7980_v26 = vld [vmem:[#allocation18_spill] sm:$0xff]  ;;  %7983 = vst [vmem:[#allocation17_spill] sm:$0xff] %v6728_v6  ;;  %v7544_v32 = vand.u32 4294901760, %v6670_v50 }
 0x138   :  { %4231 = vmatpush3.msra.mxu0 %v7964_v34  ;;  %7966 = vst [vmem:[#allocation15_spill] sm:$0xff] %v6638_v28  ;;  %4258 = vmatpush3.msra.mxu1 %v7929_v5  ;;  %v6661_v5 = vand.u32 4294901760, %v80_v58  ;;  %v6772_v27 = vsub.f32 %v78_v16, %v6708_v37  ;;  %v57_v38 = vld [vmem:[%s7322_s2 + $0x120] sm:$0xff] }
 0x139   :  { %4232 = vmatprep.subr.mxu0 %v7967_v40  ;;  %4259 = vmatprep.subr.mxu1 %v7930_v35  ;;  %v7973_v35 = vand.u32 4294901760, %v6325_v45  ;;  %v7975_v45 = vand.u32 4294901760, %v6384_v57  ;;  %v7548_v8 = vand.u32 4294901760, %v6648_v18  ;;  %v7986_v40 = vld [vmem:[#allocation27_spill] sm:$0xff] }
 0x13a   :  { %4233 = vmatpush3.msra.mxu0 %v7969_v44  ;;  %7970 = vst [vmem:[#allocation3_spill] sm:$0xff] %v6661_v5  ;;  %4260 = vmatpush3.msra.mxu1 %v7931_v15  ;;  %v6682_v15 = vsub.f32 %v65_v42, %v6638_v28  ;;  %v6715_v57 = vsub.f32 %v80_v58, %v6661_v5  ;;  %v77_v42 = vld [vmem:[%s7322_s2 + $0x1c0] sm:$0xff]  ;;  %v7545_v58 = vand.u32 4294901760, %v6695_v11  ;;  %v7987_v44 = vld [vmem:[#allocation13_spill] sm:$0xff] }
 0x13b   :  { %4234 = vmatprep.subr.mxu0 %v7971_v20  ;;  %4261 = vmatprep.subr.mxu1 %v7932_v1  ;;  %v6701_v1 = vsub.f32 %v64_v62, %v6650_v31  ;;  %v7985_v62 = vand.u32 4294901760, %v7984_v48  ;;  %v6753_v20 = vsub.f32 %v6648_v18, %v7548_v8  ;;  %v6783_v48 = vsub.f32 %v6670_v50, %v7544_v32 }
 0x13c   :  { %4235 = vmatpush3.msra.mxu0 %v7973_v35  ;;  %4262 = vmatpush3.msra.mxu1 %v7933_v21  ;;  %v61_v21 = vld [vmem:[%s7322_s2 + $0x140] sm:$0xff]  ;;  %v7547_v34 = vand.u32 4294901760, %v6682_v15  ;;  %v7555_v32 = vand.u32 4294901760, %v6741_v33 }
 0x13d   :  { %4236 = vmatprep.subr.mxu0 %v7975_v45  ;;  %4263 = vmatprep.subr.mxu1 %v7976_v2  ;;  %v6755_v35 = vand.u32 4294901760, %v61_v21  ;;  %v7549_v45 = vand.u32 4294901760, %v6701_v1  ;;  %v7989_v2 = vld [vmem:[#allocation33_spill] sm:$0xff] }
 0x13e   :  { %4237 = vmatpush3.msra.mxu0 %v7978_v24  ;;  %4264 = vmatpush3.msra.mxu1 %v7980_v26  ;;  %v6768_v24 = vand.u32 4294901760, %v77_v42  ;;  %v7551_v26 = vand.u32 4294901760, %v6715_v57  ;;  %v6796_v16 = vsub.f32 %v6682_v15, %v7547_v34  ;;  %v6855_v8 = vsub.f32 %v6741_v33, %v7555_v32  ;;  %v8000_v32 = vld [vmem:[#allocation24_spill] sm:$0xff] }
 0x13f   :  { %4238 = vmatprep.subr.mxu0 %v7982_v13  ;;  %4265 = vmatprep.subr.mxu1 %v6237_v56  ;;  %v6748_v56 = vsub.f32 %v6656_v23, %v7550_v19  ;;  %7988 = vst [vmem:[#allocation19_spill] sm:$0xff] %v6755_v35  ;;  %v6809_v4 = vsub.f32 %v61_v21, %v6755_v35  ;;  %v75_v21 = vld [vmem:[%s7322_s2 + $0x1b0] sm:$0xff] }
 0x140   :  { %4239 = vmatpush3.msra.mxu0 %v7985_v62  ;;  %2667 = vmatprep.mubr.f32.mxu0 %v7986_v40  ;;  %7990 = vst [vmem:[#allocation5_spill] sm:$0xff] %v6768_v24  ;;  %v7554_v62 = vand.u32 4294901760, %v6726_v14  ;;  %v6814_v34 = vsub.f32 %v6701_v1, %v7549_v45  ;;  %v7556_v45 = vand.u32 4294901760, %v6772_v27  ;;  %v6832_v19 = vsub.f32 %v77_v42, %v6768_v24 }
 0x141   :  { %4266 = vmatpush3.msra.mxu1 %v7987_v44  ;;  %2669 = vmatmul.mubr.f32.vlgmr.msra.gmra.mxu0 %v7989_v2  ;;  %v60_v44 = vld [vmem:[%s7322_s2 + $0x138] sm:$0xff]  ;;  %7993 = vst [vmem:[#allocation7_spill] sm:$0xff] %v6809_v4  ;;  %v6863_v13 = vand.u32 4294901760, %v75_v21 }
 0x142   :  { %4267 = vmatprep.subr.mxu1 %v7934_v47  ;;  %4278 = vmatprep.subr.mxu0 %v6567_v12  ;;  %v6778_v47 = vsub.f32 %v62_v59, %v6728_v6  ;;  %v6798_v59 = vand.u32 4294901760, %v76_v29  ;;  %7994 = vst [vmem:[#allocation11_spill] sm:$0xff] %v6832_v19  ;;  %v6842_v0 = vsub.f32 %v6726_v14, %v7554_v62 }
 0x143   :  { %4268 = vmatpush3.msra.mxu1 %v7936_v61  ;;  %4279 = vmatpush3.msra.mxu0 %v6587_v55  ;;  %v6791_v61 = vsub.f32 %v6695_v11, %v7545_v58  ;;  %7997 = vst [vmem:[#allocation26_spill] sm:$0xff] %v6863_v13  ;;  %v6879_v58 = vand.u32 4294901760, %v58_v53 }
 0x144   :  { %7991 = vst [vmem:[#allocation6_spill] sm:$0xff] %v6778_v47  ;;  %4269 = vmatprep.subr.mxu1 %v7938_v54  ;;  %7992 = vst [vmem:[#allocation28_spill] sm:$0xff] %v6798_v59  ;;  %4280 = vmatprep.subr.mxu0 %v6604_v60  ;;  %v3014_v54 = vand.u32 4294901760, %v6748_v56  ;;  %v59_v56 = vld [vmem:[%s7322_s2 + $0x130] sm:$0xff]  ;;  %v7563_v42 = vand.u32 4294901760, %v6778_v47  ;;  %v6858_v62 = vsub.f32 %v76_v29, %v6798_v59 }
 0x145   :  { %4270 = vmatpush3.msra.mxu1 %v6271_v43  ;;  %4281 = vmatpush3.msra.mxu0 %v6606_v41  ;;  %v6822_v43 = vsub.f32 %v6715_v57, %v7551_v26  ;;  %v6837_v26 = vand.u32 4294901760, %v60_v44  ;;  %7999 = vst [vmem:[#allocation32_spill] sm:$0xff] %v6879_v58 }
 0x146   :  { %4271 = vmatprep.subr.mxu1 %v6336_v7  ;;  %4282 = vmatprep.subr.mxu0 %v6617_v3  ;;  %7996 = vst [vmem:[#allocation20_spill] sm:$0xff] %v6858_v62  ;;  %v74_v7 = vld [vmem:[%s7322_s2 + $0x1a8] sm:$0xff] }
 0x147   :  { %4272 = vmatpush3.msra.mxu1 %v6355_v52  ;;  %7995 = vst [vmem:[#allocation2_spill] sm:$0xff] %v6837_v26  ;;  %4283 = vmatpush3.msra.mxu0 %v6628_v63  ;;  %v73_v52 = vld [vmem:[%s7322_s2 + $0x1a0] sm:$0xff]  ;;  %v6906_v29 = vand.u32 4294901760, %v74_v7  ;;  %v56_v63 = vld [vmem:[%s7322_s2 + $0x118] sm:$0xff] }
 0x148   :  { %4273 = vmatprep.subr.mxu1 %v6364_v46  ;;  %4284 = vmatprep.subr.mxu0 %v6636_v22  ;;  %v6865_v46 = vand.u32 4294901760, %v59_v56  ;;  %v8002_v22 = vld [vmem:[#allocation12_spill] sm:$0xff] }
 0x149   :  { %4274 = vmatpush3.msra.mxu1 %v6373_v30  ;;  %2771 = vmatprep.mubr.f32.mxu1 %v7986_v40  ;;  %v6877_v30 = vsub.f32 %v6772_v27, %v7556_v45  ;;  %v6888_v40 = vsub.f32 %v60_v44, %v6837_v26  ;;  %v6894_v45 = vsub.f32 %v6778_v47, %v7563_v42  ;;  %v8005_v47 = vsub.s32 2, %v8000_v32 }
 0x14a   :  { %7998 = vst [vmem:[#allocation21_spill] sm:$0xff] %v6865_v46  ;;  %4285 = vmatpush3.msra.mxu0 %v6638_v28  ;;  %2773 = vmatmul.mubr.f32.vlgmr.msra.gmra.mxu1 %v7989_v2  ;;  %v8001_v28 = vsub.s32 3, %v8000_v32  ;;  %8004 = vst [vmem:[#allocation31_spill] sm:$0xff] %v6906_v29  ;;  %v8008_v44 = vand.u32 4294901760, %v6809_v4  ;;  %v72_v32 = vld [vmem:[%s7322_s2 + $0x198] sm:$0xff] }
 0x14b   :  { %4286 = vmatprep.subr.mxu0 %v6661_v5  ;;  %v8003_v5 = vand.u32 4294901760, %v6687_v9  ;;  %v1907_v3 = vrot.slane %v8002_v22, %v8005_v47  ;;  %v6921_v9 = vand.u32 4294901760, %v57_v38  ;;  %v6937_v47 = vsub.f32 %v58_v53, %v6879_v58 }
 0x14c   :  { %v1911_v2 = vrot.slane %v8002_v22, %v8001_v28  ;;  %4287 = vmatpush3.msra.mxu0 %v6650_v31  ;;  %v8006_v28 = vand.u32 4294901760, %v6723_v17  ;;  %v6926_v42 = vsub.f32 %v6809_v4, %v8008_v44  ;;  %v6932_v22 = vsub.f32 %v75_v21, %v6863_v13  ;;  %v55_v21 = vld [vmem:[%s7322_s2 + $0x110] sm:$0xff] }
 0x14d   :  { %4313 = vmatprep.subr.mxu1 %v8003_v5  ;;  %4288 = vmatprep.subr.mxu0 %v6689_v51  ;;  %v6919_v5 = vsub.f32 %v59_v56, %v6865_v46  ;;  %8007 = vst [vmem:[#allocation25_spill] sm:$0xff] %v6921_v9  ;;  %v6939_v56 = vand.u32 4294901760, %v73_v52  ;;  %v8009_v44 = vand.u32 4294901760, %v6832_v19  ;;  %v6953_v53 = vand.u32 4294901760, %v56_v63 }
 0x14e   :  { %4314 = vmatpush3.msra.mxu1 %v8006_v28  ;;  %4289 = vmatpush3.msra.mxu0 %v6673_v49  ;;  %v6959_v51 = vand.u32 4294901760, %v1911_v2  ;;  %v8013_v31 = vand.u32 4294901760, %v6766_v36  ;;  %v70_v49 = vld [vmem:[%s7322_s2 + $0x188] sm:$0xff]  ;;  %v6977_v4 = vand.u32 4294901760, %v1907_v3  ;;  %v6983_v36 = vsub.f32 %v57_v38, %v6921_v9 }
 0x14f   :  { %4315 = vmatprep.subr.mxu1 %v3014_v54  ;;  %v6944_v28 = vsub.f32 %v6832_v19, %v8009_v44  ;;  %v8010_v54 = vand.u32 4294901760, %v6753_v20  ;;  %4290 = vmatprep.subr.mxu0 %v6708_v37  ;;  %8011 = vst [vmem:[#allocation30_spill] sm:$0xff] %v6953_v53  ;;  %v71_v44 = vld [vmem:[%s7322_s2 + $0x190] sm:$0xff]  ;;  %v6964_v20 = vand.u32 4294901760, %v72_v32  ;;  %v6975_v37 = vsub.f32 %v74_v7, %v6906_v29  ;;  %v54_v38 = vld [vmem:[%s7322_s2 + $0x108] sm:$0xff] }
 0x150   :  { %8012 = vst [vmem:[#allocation14_spill] sm:$0xff] %v6959_v51  ;;  %4291 = vmatpush3.msra.mxu0 %v6728_v6  ;;  %8016 = vst [vmem:[#allocation29_spill] sm:$0xff] %v6977_v4  ;;  %v8018_v19 = vand.u32 4294901760, %v6791_v61  ;;  %v8020_v6 = vand.u32 4294901760, %v6796_v16  ;;  %v8021_v61 = vand.u32 4294901760, %v6888_v40  ;;  %v7042_v16 = vand.u32 4294901760, %v54_v38  ;;  %3115 = vmatprep.mubr.f32.mxu1 %v6959_v51 }
 0x151   :  { %4316 = vmatpush3.msra.mxu1 %v8010_v54  ;;  %8014 = vst [vmem:[#allocation18_spill] sm:$0xff] %v6964_v20  ;;  %v8015_v54 = vand.u32 4294901760, %v6858_v62  ;;  %4292 = vmatprep.subr.mxu0 %v6768_v24  ;;  %v3056_v7 = vand.u32 4294901760, %v6944_v28  ;;  %v7031_v24 = vsub.f32 %v72_v32, %v6964_v20 }
 0x152   :  { %4317 = vmatprep.subr.mxu1 %v8013_v31  ;;  %v8017_v31 = vand.u32 4294901760, %v6783_v48  ;;  %4293 = vmatpush3.msra.mxu0 %v6755_v35  ;;  %v6993_v48 = vand.u32 4294901760, %v71_v44  ;;  %v2950_v28 = vsub.f32 %v6888_v40, %v8021_v61  ;;  %v69_v35 = vld [vmem:[%s7322_s2 + $0x180] sm:$0xff] }
 0x153   :  { %v6969_v17 = vsub.f32 %v6858_v62, %v8015_v54  ;;  %v2944_v54 = vand.u32 4294901760, %v6926_v42  ;;  %v6987_v62 = vand.u32 4294901760, %v55_v21  ;;  %v7000_v42 = vsub.f32 %v73_v52, %v6939_v56  ;;  %4294 = vmatprep.subr.mxu0 %v6798_v59  ;;  %v53_v61 = vld [vmem:[%s7322_s2 + $0x100] sm:$0xff] }
 0x154   :  { %4318 = vmatpush3.msra.mxu1 %v8017_v31  ;;  %8019 = vst [vmem:[#allocation34_spill] sm:$0xff] %v6993_v48  ;;  %v7011_v31 = vand.u32 4294901760, %v70_v49  ;;  %v7017_v52 = vsub.f32 %v1911_v2, %v6959_v51  ;;  %4295 = vmatpush3.msra.mxu0 %v6837_v26  ;;  %v7028_v59 = vsub.f32 %v1907_v3, %v6977_v4  ;;  %v8023_v2 = vand.u32 4294901760, %v6814_v34 }
 0x155   :  { %4319 = vmatprep.subr.mxu1 %v8018_v19  ;;  %v7006_v19 = vsub.f32 %v56_v63, %v6953_v53  ;;  %v3063_v63 = vand.u32 4294901760, %v6969_v17  ;;  %4296 = vmatprep.subr.mxu0 %v6863_v13  ;;  %v8025_v26 = vand.u32 4294901760, %v6855_v8  ;;  %v8026_v34 = vand.u32 4294901760, %v6919_v5 }
 0x156   :  { %4320 = vmatpush3.msra.mxu1 %v8020_v6  ;;  %v8022_v6 = vand.u32 4294901760, %v6822_v43  ;;  %v8024_v43 = vand.u32 4294901760, %v6932_v22  ;;  %4297 = vmatpush3.msra.mxu0 %v6865_v46  ;;  %v8027_v13 = vand.u32 4294901760, %v6842_v0  ;;  %v2951_v8 = vand.u32 4294901760, %v2950_v28 }
 0x157   :  { %v2957_v32 = vsub.f32 %v6919_v5, %v8026_v34  ;;  %4298 = vmatprep.subr.mxu0 %v6906_v29  ;;  %v8028_v34 = vand.u32 4294901760, %v6877_v30  ;;  %v7073_v28 = vsub.f32 %v70_v49, %v7011_v31  ;;  %v8030_v3 = vand.u32 4294901760, %v6894_v45 }
 0x158   :  { %4321 = vmatprep.subr.mxu1 %v8022_v6  ;;  %v3069_v17 = vsub.f32 %v6932_v22, %v8024_v43  ;;  %v7040_v6 = vsub.f32 %v55_v21, %v6987_v62  ;;  %v7055_v21 = vsub.f32 %v71_v44, %v6993_v48  ;;  %4299 = vmatpush3.msra.mxu0 %v6879_v58  ;;  %v8029_v44 = vand.u32 4294901760, %v6975_v37  ;;  %v8066_v51 = vld [vmem:[#allocation18_spill] sm:$0xff] }
 0x159   :  { %4322 = vmatpush3.msra.mxu1 %v8023_v2  ;;  %v7051_v2 = vand.u32 4294901760, %v69_v35  ;;  %4300 = vmatprep.subr.mxu0 %v6939_v56  ;;  %v8032_v46 = vand.u32 4294901760, %v6937_v47  ;;  %v2958_v49 = vand.u32 4294901760, %v2957_v32  ;;  %v8037_v32 = vand.u32 4294901760, %v6983_v36 }
 0x15a   :  { %4323 = vmatprep.subr.mxu1 %v8025_v26  ;;  %v7060_v26 = vand.u32 4294901760, %v53_v61  ;;  %v3076_v43 = vsub.f32 %v6975_v37, %v8029_v44  ;;  %v3070_v30 = vand.u32 4294901760, %v3069_v17  ;;  %4301 = vmatpush3.msra.mxu0 %v6921_v9 }
 0x15b   :  { %4324 = vmatpush3.msra.mxu1 %v8027_v13  ;;  %v2964_v44 = vsub.f32 %v6937_v47, %v8032_v46  ;;  %v8033_v13 = vand.u32 4294901760, %v7000_v42  ;;  %v7091_v17 = vsub.f32 %v69_v35, %v7051_v2  ;;  %4302 = vmatprep.subr.mxu0 %v6964_v20  ;;  %v2971_v0 = vsub.f32 %v6983_v36, %v8037_v32 }
 0x15c   :  { %4325 = vmatprep.subr.mxu1 %v8028_v34  ;;  %v7079_v34 = vsub.f32 %v54_v38, %v7042_v16  ;;  %v7095_v46 = vsub.f32 %v53_v61, %v7060_v26  ;;  %4303 = vmatpush3.msra.mxu0 %v6953_v53  ;;  %v3077_v35 = vand.u32 4294901760, %v3076_v43  ;;  %v8039_v61 = vand.u32 4294901760, %v7031_v24 }
 0x15d   :  { %4326 = vmatpush3.msra.mxu1 %v8030_v3  ;;  %v3083_v45 = vsub.f32 %v7000_v42, %v8033_v13  ;;  %8034 = vst [vmem:[#allocation13_spill] sm:$0xff] %v7091_v17  ;;  %4304 = vmatprep.subr.mxu0 %v6993_v48  ;;  %v2965_v32 = vand.u32 4294901760, %v2964_v44  ;;  %v8040_v13 = vand.u32 4294901760, %v7006_v19  ;;  %v8041_v53 = vand.u32 4294901760, %v7055_v21 }
 0x15e   :  { %8031 = vst [vmem:[#allocation27_spill] sm:$0xff] %v7079_v34  ;;  %4327 = vmatprep.subr.mxu1 %v3056_v7  ;;  %8035 = vst [vmem:[#allocation33_spill] sm:$0xff] %v7095_v46  ;;  %v8036_v7 = vand.u32 4294901760, %v7017_v52  ;;  %v3090_v20 = vsub.f32 %v7031_v24, %v8039_v61  ;;  %4305 = vmatpush3.msra.mxu0 %v6987_v62  ;;  %v2972_v44 = vand.u32 4294901760, %v2971_v0  ;;  %v8042_v48 = vand.u32 4294901760, %v7040_v6 }
 0x15f   :  { %4328 = vmatpush3.msra.mxu1 %v2944_v54  ;;  %v8038_v54 = vand.u32 4294901760, %v7028_v59  ;;  %v3097_v61 = vsub.f32 %v7055_v21, %v8041_v53  ;;  %4306 = vmatprep.subr.mxu0 %v7011_v31  ;;  %v8043_v53 = vand.u32 4294901760, %v7073_v28  ;;  %v8044_v0 = vand.u32 4294901760, %v7079_v34 }
 0x160   :  { %v2877_v38 = vsub.f32 %v7017_v52, %v8036_v7  ;;  %4329 = vmatprep.subr.mxu1 %v3063_v63  ;;  %v2978_v63 = vsub.f32 %v7006_v19, %v8040_v13  ;;  %v2985_v13 = vsub.f32 %v7040_v6, %v8042_v48  ;;  %4307 = vmatpush3.msra.mxu0 %v7042_v16  ;;  %v3091_v43 = vand.u32 4294901760, %v3090_v20 }
 0x161   :  { %v2883_v3 = vsub.f32 %v7028_v59, %v8038_v54  ;;  %4330 = vmatpush3.msra.mxu1 %v2951_v8  ;;  %v3084_v54 = vand.u32 4294901760, %v3083_v45  ;;  %v3104_v7 = vsub.f32 %v7073_v28, %v8043_v53  ;;  %4308 = vmatprep.subr.mxu0 %v7051_v2  ;;  %v3098_v48 = vand.u32 4294901760, %v3097_v61  ;;  %v8051_v53 = vld [vmem:[#allocation7_spill] sm:$0xff] }
 0x162   :  { %4331 = vmatprep.subr.mxu1 %v3070_v30  ;;  %v2878_v8 = vand.u32 4294901760, %v2877_v38  ;;  %v7604_v30 = vand.u32 4294901760, %v7095_v46  ;;  %v2992_v38 = vsub.f32 %v7079_v34, %v8044_v0  ;;  %4309 = vmatpush3.msra.mxu0 %v7060_v26  ;;  %v8053_v0 = vld [vmem:[#allocation20_spill] sm:$0xff] }
 0x163   :  { %4332 = vmatpush3.msra.mxu1 %v2958_v49  ;;  %v2884_v45 = vand.u32 4294901760, %v2883_v3  ;;  %v2979_v49 = vand.u32 4294901760, %v2978_v63  ;;  %v2986_v3 = vand.u32 4294901760, %v2985_v13  ;;  %v3105_v63 = vand.u32 4294901760, %v3104_v7  ;;  %4348 = vmatprep.subr.mxu0 %v6599_v25  ;;  %v8046_v7 = vld [vmem:[#allocation10_spill] sm:$0xff]  ;;  %v8049_v13 = vld [vmem:[#allocation11_spill] sm:$0xff] }
 0x164   :  { %4333 = vmatprep.subr.mxu1 %v3077_v35  ;;  %v8045_v35 = vand.u32 4294901760, %v7091_v17  ;;  %2879 = vmatprep.mubr.f32.mxu0 %v2878_v8 }
 0x165   :  { %4334 = vmatpush3.msra.mxu1 %v2965_v32  ;;  %v2999_v32 = vsub.f32 %v7095_v46, %v7604_v30  ;;  %2885 = vmatmul.mubr.f32.vlgmr.msra.gmra.mxu0 %v2884_v45  ;;  %v8050_v45 = vld [vmem:[#allocation8_spill] sm:$0xff]  ;;  %v8064_v30 = vld [vmem:[#allocation26_spill] sm:$0xff] }
 0x166   :  { %4335 = vmatprep.subr.mxu1 %v3084_v54  ;;  %v3111_v20 = vsub.f32 %v7091_v17, %v8045_v35  ;;  %v2993_v54 = vand.u32 4294901760, %v2992_v38  ;;  %4349 = vmatpush3.msra.mxu0 %v6626_v39  ;;  %v8054_v38 = vld [vmem:[#allocation3_spill] sm:$0xff]  ;;  %v8056_v35 = vld [vmem:[#allocation16_spill] sm:$0xff] }
 0x167   :  { %4336 = vmatpush3.msra.mxu1 %v2972_v44  ;;  %4350 = vmatprep.subr.mxu0 %v6656_v23  ;;  %v3000_v8 = vand.u32 4294901760, %v2999_v32  ;;  %v8048_v44 = vld [vmem:[#allocation9_spill] sm:$0xff] }
 0x168   :  { %4337 = vmatprep.subr.mxu1 %v3091_v43  ;;  %v3112_v61 = vand.u32 4294901760, %v3111_v20  ;;  %4351 = vmatpush3.msra.mxu0 %v6648_v18  ;;  %v8047_v43 = vld [vmem:[#allocation6_spill] sm:$0xff]  ;;  %v8059_v32 = vld [vmem:[#allocation17_spill] sm:$0xff] }
 0x169   :  { %4338 = vmatpush3.msra.mxu1 %v2979_v49  ;;  %4352 = vmatprep.subr.mxu0 %v6664_v10  ;;  %v8052_v49 = vld [vmem:[#allocation15_spill] sm:$0xff]  ;;  %v8057_v20 = vld [vmem:[#allocation22_spill] sm:$0xff] }
 0x16a   :  { %4339 = vmatprep.subr.mxu1 %v3098_v48  ;;  %4353 = vmatpush3.msra.mxu0 %v6670_v50  ;;  %v8055_v48 = vld [vmem:[#allocation23_spill] sm:$0xff] }
 0x16b   :  { %4340 = vmatpush3.msra.mxu1 %v2986_v3  ;;  %4354 = vmatprep.subr.mxu0 %v6695_v11  ;;  %v8058_v3 = vld [vmem:[#allocation4_spill] sm:$0xff] }
 0x16c   :  { %4341 = vmatprep.subr.mxu1 %v3105_v63  ;;  %4355 = vmatpush3.msra.mxu0 %v6682_v15  ;;  %v8060_v63 = vld [vmem:[#allocation5_spill] sm:$0xff] }
 0x16d   :  { %4342 = vmatpush3.msra.mxu1 %v2993_v54  ;;  %4356 = vmatprep.subr.mxu0 %v6715_v57  ;;  %v8061_v54 = vld [vmem:[#allocation19_spill] sm:$0xff] }
 0x16e   :  { %4343 = vmatprep.subr.mxu1 %v3112_v61  ;;  %4357 = vmatpush3.msra.mxu0 %v6701_v1  ;;  %v8062_v61 = vld [vmem:[#allocation28_spill] sm:$0xff] }
 0x16f   :  { %4344 = vmatpush3.msra.mxu1 %v3000_v8  ;;  %4358 = vmatprep.subr.mxu0 %v6741_v33  ;;  %v8063_v8 = vld [vmem:[#allocation2_spill] sm:$0xff] }
 0x170   :  { %3117 = vmatmul.mubr.f32.vlgmr.msra.gmra.mxu1 %v6977_v4  ;;  %4383 = vmatprep.subr.mxu1 %v6567_v12  ;;  %v8065_v4 = vld [vmem:[#allocation21_spill] sm:$0xff] }
 0x171   :  { %4384 = vmatpush3.msra.mxu1 %v6587_v55  ;;  %4359 = vmatpush3.msra.mxu0 %v6726_v14 }
 0x172   :  { %4385 = vmatprep.subr.mxu1 %v6604_v60  ;;  %4360 = vmatprep.subr.mxu0 %v6772_v27 }
 0x173   :  { %4386 = vmatpush3.msra.mxu1 %v6606_v41  ;;  %4361 = vmatpush3.msra.mxu0 %v8047_v43 }
 0x174   :  { %4387 = vmatprep.subr.mxu1 %v8046_v7  ;;  %4362 = vmatprep.subr.mxu0 %v8049_v13 }
 0x175   :  { %4388 = vmatpush3.msra.mxu1 %v8048_v44  ;;  %4363 = vmatpush3.msra.mxu0 %v8051_v53 }
 0x176   :  { %4389 = vmatprep.subr.mxu1 %v8050_v45  ;;  %4364 = vmatprep.subr.mxu0 %v8053_v0 }
 0x177   :  { %4390 = vmatpush3.msra.mxu1 %v8052_v49  ;;  %4365 = vmatpush3.msra.mxu0 %v6888_v40 }
 0x178   :  { %4391 = vmatprep.subr.mxu1 %v8054_v38  ;;  %4366 = vmatprep.subr.mxu0 %v6932_v22 }
 0x179   :  { %4392 = vmatpush3.msra.mxu1 %v8055_v48  ;;  %4367 = vmatpush3.msra.mxu0 %v6919_v5 }
 0x17a   :  { %4393 = vmatprep.subr.mxu1 %v8056_v35  ;;  %4368 = vmatprep.subr.mxu0 %v6975_v37 }
 0x17b   :  { %4394 = vmatpush3.msra.mxu1 %v8057_v20  ;;  %4369 = vmatpush3.msra.mxu0 %v6937_v47 }
 0x17c   :  { %4395 = vmatprep.subr.mxu1 %v8058_v3  ;;  %4370 = vmatprep.subr.mxu0 %v7000_v42 }
 0x17d   :  { %4396 = vmatpush3.msra.mxu1 %v8059_v32  ;;  %4371 = vmatpush3.msra.mxu0 %v6983_v36 }
 0x17e   :  { %4397 = vmatprep.subr.mxu1 %v8060_v63  ;;  %4372 = vmatprep.subr.mxu0 %v7031_v24 }
 0x17f   :  { %4398 = vmatpush3.msra.mxu1 %v8061_v54  ;;  %4373 = vmatpush3.msra.mxu0 %v7006_v19 }
 0x180   :  { %4399 = vmatprep.subr.mxu1 %v8062_v61  ;;  %4374 = vmatprep.subr.mxu0 %v7055_v21 }
 0x181   :  { %4400 = vmatpush3.msra.mxu1 %v8063_v8  ;;  %4375 = vmatpush3.msra.mxu0 %v7040_v6 }
 0x182   :  { %4401 = vmatprep.subr.mxu1 %v8064_v30  ;;  %4376 = vmatprep.subr.mxu0 %v7073_v28 }
 0x183   :  { %4402 = vmatpush3.msra.mxu1 %v8065_v4  ;;  %4377 = vmatpush3.msra.mxu0 %v7079_v34  ;;  %v8068_v34 = vld [vmem:[#allocation30_spill] sm:$0xff] }
 0x184   :  { %4403 = vmatprep.subr.mxu1 %v6906_v29  ;;  %4378 = vmatprep.subr.mxu0 %v7091_v17  ;;  %v8067_v29 = vand.u32 4294901760, %v6599_v25  ;;  %v8070_v17 = vld [vmem:[#allocation34_spill] sm:$0xff]  ;;  %v8073_v25 = vand.u32 4294901760, %v6664_v10  ;;  %v8078_v10 = vand.u32 4294901760, %v7028_v59 }
 0x185   :  { %4404 = vmatpush3.msra.mxu1 %v6879_v58  ;;  %4379 = vmatpush3.msra.mxu0 %v7095_v46  ;;  %v8069_v58 = vand.u32 4294901760, %v6626_v39  ;;  %v8071_v46 = vand.u32 4294901760, %v6656_v23  ;;  %v8074_v39 = vand.u32 4294901760, %v6670_v50  ;;  %v8075_v23 = vand.u32 4294901760, %v6695_v11 }
 0x186   :  { %4405 = vmatprep.subr.mxu1 %v6939_v56  ;;  %3252 = vmatprep.mubr.f32.mxu0 %v7017_v52  ;;  %v8080_v50 = vand.u32 4294901760, %v6701_v1  ;;  %v8081_v11 = vand.u32 4294901760, %v6741_v33  ;;  %v8088_v1 = vand.u32 4294901760, %v6888_v40  ;;  %v8090_v33 = vand.u32 4294901760, %v6919_v5 }
 0x187   :  { %4406 = vmatpush3.msra.mxu1 %v6921_v9  ;;  %3255 = vmatmul.mubr.f32.vlgmr.msra.gmra.mxu0 %v7028_v59  ;;  %v8072_v9 = vand.u32 4294901760, %v6648_v18  ;;  %v8076_v18 = vand.u32 4294901760, %v7017_v52  ;;  %v8092_v59 = vand.u32 4294901760, %v6937_v47  ;;  %v8093_v40 = vand.u32 4294901760, %v7000_v42  ;;  %v8101_v42 = vld [vmem:[#allocation27_spill] sm:$0xff]  ;;  %v8103_v52 = vld [vmem:[#allocation32_spill] sm:$0xff] }
 0x188   :  { %4407 = vmatprep.subr.mxu1 %v8066_v51  ;;  %4418 = vmatprep.subr.mxu0 %v8067_v29  ;;  %v8079_v29 = vand.u32 4294901760, %v6715_v57  ;;  %v8083_v57 = vand.u32 4294901760, %v6772_v27  ;;  %v8091_v27 = vand.u32 4294901760, %v6975_v37  ;;  %v8094_v5 = vand.u32 4294901760, %v6983_v36  ;;  %v8100_v36 = vld [vmem:[#allocation31_spill] sm:$0xff] }
 0x189   :  { %4408 = vmatpush3.msra.mxu1 %v8068_v34  ;;  %4419 = vmatpush3.msra.mxu0 %v8069_v58  ;;  %v8077_v58 = vand.u32 4294901760, %v6682_v15  ;;  %v8082_v15 = vand.u32 4294901760, %v6726_v14  ;;  %v8089_v14 = vand.u32 4294901760, %v6932_v22  ;;  %v8095_v37 = vand.u32 4294901760, %v7031_v24 }
 0x18a   :  { %4409 = vmatprep.subr.mxu1 %v8070_v17  ;;  %4420 = vmatprep.subr.mxu0 %v8071_v46  ;;  %v8097_v22 = vand.u32 4294901760, %v7055_v21  ;;  %v8098_v47 = vand.u32 4294901760, %v7040_v6  ;;  %v8099_v24 = vand.u32 4294901760, %v7073_v28  ;;  %v8104_v46 = vld [vmem:[#allocation13_spill] sm:$0xff] }
 0x18b   :  { %4410 = vmatpush3.msra.mxu1 %v6987_v62  ;;  %4421 = vmatpush3.msra.mxu0 %v8072_v9  ;;  %v8096_v9 = vand.u32 4294901760, %v7006_v19  ;;  %v8102_v19 = vand.u32 4294901760, %v8101_v42  ;;  %v8105_v21 = vand.u32 4294901760, %v8104_v46  ;;  %v8110_v28 = vld [vmem:[#allocation29_spill] sm:$0xff] }
 0x18c   :  { %4411 = vmatprep.subr.mxu1 %v7011_v31  ;;  %4422 = vmatprep.subr.mxu0 %v8073_v25 }
 0x18d   :  { %4412 = vmatpush3.msra.mxu1 %v7042_v16  ;;  %4423 = vmatpush3.msra.mxu0 %v8074_v39 }
 0x18e   :  { %4413 = vmatprep.subr.mxu1 %v7051_v2  ;;  %4424 = vmatprep.subr.mxu0 %v8075_v23 }
 0x18f   :  { %4414 = vmatpush3.msra.mxu1 %v7060_v26  ;;  %3359 = vmatprep.mubr.f32.mxu1 %v8076_v18 }
 0x190   :  { %4425 = vmatpush3.msra.mxu0 %v8077_v58  ;;  %3363 = vmatmul.mubr.f32.vlgmr.msra.gmra.mxu1 %v8078_v10 }
 0x191   :  { %4426 = vmatprep.subr.mxu0 %v8079_v29  ;;  %4453 = vmatprep.subr.mxu1 %v6567_v12  ;;  %v8084_v12 = vand.u32 4294901760, %v8047_v43  ;;  %v3715_v43 = vpop.f32.mrf.mxu1 }
 0x192   :  { %4427 = vmatpush3.msra.mxu0 %v8080_v50  ;;  %4454 = vmatpush3.msra.mxu1 %v6587_v55  ;;  %v8085_v55 = vand.u32 4294901760, %v8049_v13 }
 0x193   :  { %4428 = vmatprep.subr.mxu0 %v8081_v11  ;;  %4455 = vmatprep.subr.mxu1 %v6604_v60  ;;  %v8086_v60 = vand.u32 4294901760, %v8051_v53 }
 0x194   :  { %4429 = vmatpush3.msra.mxu0 %v8082_v15  ;;  %4456 = vmatpush3.msra.mxu1 %v6606_v41  ;;  %v8087_v41 = vand.u32 4294901760, %v8053_v0 }
 0x195   :  { %4430 = vmatprep.subr.mxu0 %v8083_v57  ;;  %4457 = vmatprep.subr.mxu1 %v8046_v7  ;;  %v8108_v7 = vld [vmem:[#allocation14_spill] sm:$0xff] }
 0x196   :  { %4431 = vmatpush3.msra.mxu0 %v8084_v12  ;;  %4458 = vmatpush3.msra.mxu1 %v8048_v44  ;;  %v3716_v44 = vpop.f32.mrf.mxu1 }
 0x197   :  { %4432 = vmatprep.subr.mxu0 %v8085_v55  ;;  %4459 = vmatprep.subr.mxu1 %v8050_v45 }
 0x198   :  { %4433 = vmatpush3.msra.mxu0 %v8086_v60  ;;  %4460 = vmatpush3.msra.mxu1 %v8052_v49  ;;  %v3785_v45 = vpop.f32.mrf.mxu1 }
 0x199   :  { %4434 = vmatprep.subr.mxu0 %v8087_v41  ;;  %4461 = vmatprep.subr.mxu1 %v8054_v38 }
 0x19a   :  { %4435 = vmatpush3.msra.mxu0 %v8088_v1  ;;  %4462 = vmatpush3.msra.mxu1 %v8055_v48  ;;  %v3786_v53 = vpop.f32.mrf.mxu1 }
 0x19b   :  { %4436 = vmatprep.subr.mxu0 %v8089_v14  ;;  %4463 = vmatprep.subr.mxu1 %v8056_v35  ;;  %v3787_v39 = vadd.f32 %v3786_v53, %v3785_v45 }
 0x19c   :  { %4437 = vmatpush3.msra.mxu0 %v8090_v33  ;;  %4464 = vmatpush3.msra.mxu1 %v8057_v20  ;;  %v3855_v49 = vpop.f32.mrf.mxu1 }
 0x19d   :  { %4438 = vmatprep.subr.mxu0 %v8091_v27  ;;  %4465 = vmatprep.subr.mxu1 %v8058_v3  ;;  %v3717_v3 = vadd.f32 %v3716_v44, %v3715_v43 }
 0x19e   :  { %4439 = vmatpush3.msra.mxu0 %v8092_v59  ;;  %4466 = vmatpush3.msra.mxu1 %v8059_v32  ;;  %v3856_v0 = vpop.f32.mrf.mxu1 }
 0x19f   :  { %4440 = vmatprep.subr.mxu0 %v8093_v40  ;;  %4467 = vmatprep.subr.mxu1 %v8060_v63  ;;  %v3857_v50 = vadd.f32 %v3856_v0, %v3855_v49 }
 0x1a0   :  { %4441 = vmatpush3.msra.mxu0 %v8094_v5  ;;  %4468 = vmatpush3.msra.mxu1 %v8061_v54  ;;  %v3925_v38 = vpop.f32.mrf.mxu1 }
 0x1a1   :  { %4442 = vmatprep.subr.mxu0 %v8095_v37  ;;  %4469 = vmatprep.subr.mxu1 %v8062_v61 }
 0x1a2   :  { %4443 = vmatpush3.msra.mxu0 %v8096_v9  ;;  %4470 = vmatpush3.msra.mxu1 %v8063_v8  ;;  %v3926_v48 = vpop.f32.mrf.mxu1 }
 0x1a3   :  { %4444 = vmatprep.subr.mxu0 %v8097_v22  ;;  %4471 = vmatprep.subr.mxu1 %v8064_v30  ;;  %v8106_v30 = vld [vmem:[#allocation33_spill] sm:$0xff]  ;;  %v3927_v41 = vadd.f32 %v3926_v48, %v3925_v38 }
 0x1a4   :  { %4445 = vmatpush3.msra.mxu0 %v8098_v47  ;;  %4472 = vmatpush3.msra.mxu1 %v8065_v4  ;;  %v8107_v6 = vand.u32 4294901760, %v8106_v30  ;;  %v8109_v4 = vld [vmem:[#allocation25_spill] sm:$0xff]  ;;  %v3995_v35 = vpop.f32.mrf.mxu1 }
 0x1a5   :  { %4446 = vmatprep.subr.mxu0 %v8099_v24  ;;  %4473 = vmatprep.subr.mxu1 %v8100_v36 }
 0x1a6   :  { %4447 = vmatpush3.msra.mxu0 %v8102_v19  ;;  %4474 = vmatpush3.msra.mxu1 %v8103_v52  ;;  %v3996_v32 = vpop.f32.mrf.mxu1 }
 0x1a7   :  { %4448 = vmatprep.subr.mxu0 %v8105_v21  ;;  %4475 = vmatprep.subr.mxu1 %v6939_v56  ;;  %v3680_v56 = vpop.f32.mrf.mxu0  ;;  %v3997_v5 = vadd.f32 %v3996_v32, %v3995_v35 }
 0x1a8   :  { %4449 = vmatpush3.msra.mxu0 %v8107_v6  ;;  %3529 = vmatprep.mubr.f32.mxu0 %v8108_v7  ;;  %v4065_v8 = vpop.f32.mrf.mxu1 }
 0x1a9   :  { %4476 = vmatpush3.msra.mxu1 %v8109_v4  ;;  %3531 = vmatmul.mubr.f32.vlgmr.msra.gmra.mxu0 %v8110_v28 }
 0x1aa   :  { %4477 = vmatprep.subr.mxu1 %v8066_v51  ;;  %3633 = vmatprep.mubr.f32.mxu1 %v8108_v7  ;;  %v3681_v51 = vpop.f32.mrf.mxu0  ;;  %v4066_v10 = vpop.f32.mrf.mxu1 }
 0x1ab   :  { %4478 = vmatpush3.msra.mxu1 %v8068_v34  ;;  %v3682_v63 = vadd.f32 %v3681_v51, %v3680_v56  ;;  %v4067_v36 = vadd.f32 %v4066_v10, %v4065_v8 }
 0x1ac   :  { %4479 = vmatprep.subr.mxu1 %v8070_v17  ;;  %v3750_v34 = vpop.f32.mrf.mxu0 }
 0x1ad   :  { %4480 = vmatpush3.msra.mxu1 %v6987_v62  ;;  %v512_v25 = vadd.f32 %v3717_v3, %v3682_v63 }
 0x1ae   :  { %4481 = vmatprep.subr.mxu1 %v7011_v31  ;;  %v3751_v13 = vpop.f32.mrf.mxu0 }
 0x1af   :  { %4482 = vmatpush3.msra.mxu1 %v7042_v16  ;;  %v3752_v54 = vadd.f32 %v3751_v13, %v3750_v34 }
 0x1b0   :  { %4483 = vmatprep.subr.mxu1 %v7051_v2  ;;  %v3820_v17 = vpop.f32.mrf.mxu0 }
 0x1b1   :  { %4484 = vmatpush3.msra.mxu1 %v7060_v26  ;;  %v650_v18 = vadd.f32 %v3752_v54, %v512_v25 }
 0x1b2   :  { %3635 = vmatmul.mubr.f32.vlgmr.msra.gmra.mxu1 %v8110_v28  ;;  %v3821_v62 = vpop.f32.mrf.mxu0 }
 0x1b3   :  { %v3822_v58 = vadd.f32 %v3821_v62, %v3820_v17  ;;  %v758_v29 = vadd.f32 %v3787_v39, %v650_v18 }
 0x1b4   :  { %v3890_v31 = vpop.f32.mrf.mxu0 }
 0x1b5   :  { %v926_v57 = vadd.f32 %v3822_v58, %v758_v29  ;;  %v3640_v58 = vld [vmem:[%s7324_s4] sm:$0x1] }
 0x1b6   :  { %v3891_v16 = vpop.f32.mrf.mxu0 }
 0x1b7   :  { %v3892_v12 = vadd.f32 %v3891_v16, %v3890_v31  ;;  %v1030_v60 = vadd.f32 %v3857_v50, %v926_v57 }
 0x1b8   :  { %v3960_v2 = vpop.f32.mrf.mxu0 }
 0x1b9   :  { %v1142_v14 = vadd.f32 %v3892_v12, %v1030_v60 }
 0x1ba   :  { %v3961_v26 = vpop.f32.mrf.mxu0 }
 0x1bb   :  { %v3962_v33 = vadd.f32 %v3961_v26, %v3960_v2  ;;  %v1374_v40 = vadd.f32 %v3927_v41, %v1142_v14 }
 0x1bc   :  { %v4030_v20 = vpop.f32.mrf.mxu0 }
 0x1bd   :  { %v1512_v9 = vadd.f32 %v3962_v33, %v1374_v40 }
 0x1be   :  { %v4031_v61 = vpop.f32.mrf.mxu0 }
 0x1bf   :  { %v4032_v22 = vadd.f32 %v4031_v61, %v4030_v20  ;;  %v1620_v24 = vadd.f32 %v3997_v5, %v1512_v9 }
 0x1c0   :  { %v4100_v23 = vpop.f32.mrf.mxu0 }
 0x1c1   :  { %v1788_v52 = vadd.f32 %v4032_v22, %v1620_v24 }
 0x1c2   :  { %v4101_v11 = vpop.f32.mrf.mxu0 }
 0x1c3   :  { %v4102_v46 = vadd.f32 %v4101_v11, %v4100_v23  ;;  %v1892_v30 = vadd.f32 %v4067_v36, %v1788_v52 }
 0x1c5   :  { %v2025_v4 = vadd.f32 %v4102_v46, %v1892_v30 }
 0x1c7   :  { %v4135_v15 = vpop.f32.mrf.mxu1 }
 0x1c9   :  { %v4136_v1 = vpop.f32.mrf.mxu1 }
 0x1ca   :  { %v4137_v6 = vadd.f32 %v4136_v1, %v4135_v15 }
 0x1cc   :  { %v2257_v43 = vadd.f32 %v4137_v6, %v2025_v4 }
 0x1df   :  { %v4170_v55 = vpop.f32.mrf.mxu0 }
 0x1e1   :  { %v4171_v27 = vpop.f32.mrf.mxu0 }
 0x1e2   :  { %v4172_v28 = vadd.f32 %v4171_v27, %v4170_v55 }
 0x1e4   :  { %v2395_v13 = vadd.f32 %v4172_v28, %v2257_v43 }
 0x1e8   :  { %v4205_v59 = vpop.f32.mrf.mxu1 }
 0x1ea   :  { %v4206_v47 = vpop.f32.mrf.mxu1 }
 0x1eb   :  { %v4207_v34 = vadd.f32 %v4206_v47, %v4205_v59 }
 0x1ed   :  { %v2503_v53 = vadd.f32 %v4207_v34, %v2395_v13 }
 0x201   :  { %v4240_v37 = vpop.f32.mrf.mxu0 }
 0x203   :  { %v4241_v42 = vpop.f32.mrf.mxu0 }
 0x204   :  { %v4242_v45 = vadd.f32 %v4241_v42, %v4240_v37 }
 0x206   :  { %v2671_v0 = vadd.f32 %v4242_v45, %v2503_v53 }
 0x20a   :  { %v4275_v19 = vpop.f32.mrf.mxu1 }
 0x20c   :  { %v4276_v7 = vpop.f32.mrf.mxu1 }
 0x20d   :  { %v4277_v62 = vadd.f32 %v4276_v7, %v4275_v19 }
 0x20f   :  { %v2775_v2 = vadd.f32 %v4277_v62, %v2671_v0 }
 0x225   :  { %v4310_v21 = vpop.f32.mrf.mxu0 }
 0x227   :  { %v4311_v56 = vpop.f32.mrf.mxu0 }
 0x228   :  { %v4312_v16 = vadd.f32 %v4311_v56, %v4310_v21 }
 0x22a   :  { %v2887_v35 = vadd.f32 %v4312_v16, %v2775_v2 }
 0x230   :  { %v4345_v51 = vpop.f32.mrf.mxu1 }
 0x232   :  { %v4346_v17 = vpop.f32.mrf.mxu1 }
 0x233   :  { %v4347_v48 = vadd.f32 %v4346_v17, %v4345_v51 }
 0x235   :  { %v3119_v32 = vadd.f32 %v4347_v48, %v2887_v35 }
 0x247   :  { %v4380_v44 = vpop.f32.mrf.mxu0 }
 0x249   :  { %v4381_v49 = vpop.f32.mrf.mxu0 }
 0x24a   :  { %v4382_v20 = vadd.f32 %v4381_v49, %v4380_v44 }
 0x24c   :  { %v3257_v54 = vadd.f32 %v4382_v20, %v3119_v32 }
 0x250   :  { %v4415_v31 = vpop.f32.mrf.mxu1 }
 0x252   :  { %v4416_v26 = vpop.f32.mrf.mxu1 }
 0x253   :  { %v4417_v63 = vadd.f32 %v4416_v26, %v4415_v31 }
 0x255   :  { %v3365_v25 = vadd.f32 %v4417_v63, %v3257_v54 }
 0x269   :  { %v4450_v38 = vpop.f32.mrf.mxu0 }
 0x26b   :  { %v4451_v3 = vpop.f32.mrf.mxu0 }
 0x26c   :  { %v4452_v61 = vadd.f32 %v4451_v3, %v4450_v38 }
 0x26e   :  { %v3533_v23 = vadd.f32 %v4452_v61, %v3365_v25 }
 0x272   :  { %v4485_v8 = vpop.f32.mrf.mxu1 }
 0x274   :  { %v4486_v39 = vpop.f32.mrf.mxu1 }
 0x275   :  { %v4487_v18 = vadd.f32 %v4486_v39, %v4485_v8 }
 0x277   :  { %v3637_v10 = vadd.f32 %v4487_v18, %v3533_v23 }
 0x279   :  { %v3641_v29 = vadd.f32 %v3640_v58, %v3637_v10 }
 0x27b   :  { %3643 = vst.msk [vmem:[%s7325_s5] sm:$0x1] %vm3642_vm0, %v3641_v29 }

</bundles_post_ra>
